<compile_context>
chip_gen: v7x
topology: tpu7x:2x2x1
jax: 0.10.0
libtpu: 0.0.40
codegen_flags: <defaults>
</compile_context>

<pallas_src>
import jax
import jax.numpy as jnp
from jax.experimental import pallas as pl
from jax.experimental.pallas import tpu as pltpu

BN_EPS = 1e-5


def _encoder_kernel(x_ref, w1_ref, b1_ref, w2_ref, b2_ref,
                    w3g_ref, w3l_ref, b3_ref, w4_ref, b4_ref, o_ref):
    # x_ref:   (Gb, N, 3)   Gb point groups per grid step
    # w1_ref:  (3, 128)     conv1a weight with BN1 folded in (pre-transposed)
    # b1_ref:  (1, 128)
    # w2_ref:  (128, 256)   conv1b
    # b2_ref:  (1, 256)
    # w3g_ref: (256, 512)   conv2a rows that multiply the per-group global feature
    # w3l_ref: (256, 512)   conv2a rows that multiply the per-point feature
    # b3_ref:  (1, 512)     conv2a bias with BN2 folded in
    # w4_ref:  (512, C)     conv2b
    # b4_ref:  (1, C)
    # o_ref:   (Gb, C)      per-group global feature
    Gb, N, _ = x_ref.shape
    C = o_ref.shape[-1]

    x = x_ref[...].reshape(Gb * N, 3)

    # first_conv: Conv1d(3,128,1) + BN(128)[folded] + ReLU + Conv1d(128,256,1)
    h = jnp.dot(x, w1_ref[...], preferred_element_type=jnp.float32) + b1_ref[...]
    h = jnp.maximum(h, 0.0)                                                    # (Gb*N, 128)
    f = jnp.dot(h, w2_ref[...], preferred_element_type=jnp.float32) + b2_ref[...]  # (Gb*N, 256)

    # per-group max pool over the N points
    fg = jnp.max(f.reshape(Gb, N, 256), axis=1)                                # (Gb, 256)

    # second_conv part 1: Conv1d(512,512,1)+BN[folded]+ReLU on concat([global, local]).
    # The global contribution is identical for all N points of a group, so it is
    # computed once per group and broadcast (saves ~half the conv2a FLOPs and the
    # lane concatenate).
    g_part = jnp.dot(fg, w3g_ref[...], preferred_element_type=jnp.float32)     # (Gb, 512)
    l_part = jnp.dot(f, w3l_ref[...], preferred_element_type=jnp.float32)      # (Gb*N, 512)
    h2 = l_part.reshape(Gb, N, 512) + g_part[:, None, :] + b3_ref[...]
    h2 = jnp.maximum(h2, 0.0).reshape(Gb * N, 512)

    # second_conv part 2: Conv1d(512, C, 1), then per-group max pool.
    out = jnp.dot(h2, w4_ref[...], preferred_element_type=jnp.float32) + b4_ref[...]  # (Gb*N, C)
    o_ref[...] = jnp.max(out.reshape(Gb, N, C), axis=1).astype(o_ref.dtype)


def encoder_forward(point_groups, params, *, encoder_channel, groups_per_block=8):
    """point_groups: (B, G, N, 3) float32. params: raw PyTorch-layout weights."""
    B, G, N, _ = point_groups.shape
    BG = B * G
    C = encoder_channel
    eps = BN_EPS

    # Clamp the block size and pad the (B*G) group axis so any batch works.
    Gb = max(1, min(groups_per_block, BG))
    num_blocks = pl.cdiv(BG, Gb)
    BG_pad = num_blocks * Gb

    # ---- host-side constant transforms (fold BN, transpose, split conv2a) ----
    s1 = params["bn1_gamma"] / jnp.sqrt(params["bn1_var"] + eps)
    w1f = params["w1"][:, :, 0].T * s1                                     # (3, 128)
    b1f = (params["b1"] - params["bn1_mean"]) * s1 + params["bn1_beta"]    # (128,)

    w2t = params["w2"][:, :, 0].T                                          # (128, 256)
    b2 = params["b2"]

    s2 = params["bn2_gamma"] / jnp.sqrt(params["bn2_var"] + eps)
    w3f = params["w3"][:, :, 0].T * s2                                     # (512, 512)
    b3f = (params["b3"] - params["bn2_mean"]) * s2 + params["bn2_beta"]    # (512,)
    w3g, w3l = w3f[:256], w3f[256:]                                        # global / local input rows

    w4t = params["w4"][:, :, 0].T                                          # (512, C)
    b4 = params["b4"]

    x = point_groups.reshape(BG, N, 3)
    if BG_pad != BG:
        # Zero-padded groups are computed but discarded; per-group pooling means
        # they never contaminate real groups.
        x = jnp.pad(x, ((0, BG_pad - BG), (0, 0), (0, 0)))

    row = lambda v: v.reshape(1, -1)
    const = lambda i: (0, 0)   # weights are grid-invariant (constant index_map)

    # Advisory cost hint for XLA's scheduler around the custom call.
    M = BG_pad * N
    flops = 2 * M * (3 * 128 + 128 * 256 + 256 * 512 + 512 * C) \
        + 2 * BG_pad * 256 * 512
    weight_bytes = 4 * (3 * 128 + 128 * 256 + 512 * 512 + 512 * C + 128 + 256 + 512 + C)
    bytes_accessed = 4 * (x.size + BG_pad * C) + weight_bytes
    cost = pl.CostEstimate(flops=flops, transcendentals=0,
                           bytes_accessed=bytes_accessed)

    out = pl.pallas_call(
        _encoder_kernel,
        out_shape=jax.ShapeDtypeStruct((num_blocks, Gb, C), point_groups.dtype),
        grid_spec=pltpu.PrefetchScalarGridSpec(
            num_scalar_prefetch=0,
            grid=(num_blocks,),
            in_specs=[
                pl.BlockSpec((Gb, N, 3), lambda i: (i, 0, 0)),
                pl.BlockSpec((3, 128), const),
                pl.BlockSpec((1, 128), const),
                pl.BlockSpec((128, 256), const),
                pl.BlockSpec((1, 256), const),
                pl.BlockSpec((256, 512), const),
                pl.BlockSpec((256, 512), const),
                pl.BlockSpec((1, 512), const),
                pl.BlockSpec((512, C), const),
                pl.BlockSpec((1, C), const),
            ],
            # leading size-1 dim squeezed out -> kernel sees a lane-dense (Gb, C) slab
            out_specs=pl.BlockSpec((None, Gb, C), lambda i: (i, 0, 0)),
        ),
        # Weights total ~1.7 MiB f32 (constant index_map -> copied once, stay
        # resident); per-block activations (Gb*N, 512) f32 stay well inside the
        # scoped VMEM limit on all generations.  The batch-of-groups axis is
        # "parallel" so v7x can shard it across its 2 TensorCores.
        compiler_params=pltpu.CompilerParams(
            dimension_semantics=("parallel",)),
        cost_estimate=cost,
    )(x, w1f, row(b1f), w2t, row(b2), w3g, w3l, row(b3f), w4t, row(b4))

    out = out.reshape(BG_pad, C)[:BG]
    return out.reshape(B, G, C)


def reference_forward(point_groups, params, encoder_channel):
    """Pure-JAX eval-mode reference matching the PyTorch module."""
    B, G, N, _ = point_groups.shape
    eps = BN_EPS
    x = point_groups.reshape(B * G, N, 3)
    h = x @ params["w1"][:, :, 0].T + params["b1"]
    h = (h - params["bn1_mean"]) / jnp.sqrt(params["bn1_var"] + eps) \
        * params["bn1_gamma"] + params["bn1_beta"]
    h = jnp.maximum(h, 0.0)
    f = h @ params["w2"][:, :, 0].T + params["b2"]                         # (BG, N, 256)
    fg = jnp.max(f, axis=1, keepdims=True)                                 # (BG, 1, 256)
    feat = jnp.concatenate([jnp.broadcast_to(fg, f.shape), f], axis=-1)    # (BG, N, 512)
    h2 = feat @ params["w3"][:, :, 0].T + params["b3"]
    h2 = (h2 - params["bn2_mean"]) / jnp.sqrt(params["bn2_var"] + eps) \
        * params["bn2_gamma"] + params["bn2_beta"]
    h2 = jnp.maximum(h2, 0.0)
    out = h2 @ params["w4"][:, :, 0].T + params["b4"]                      # (BG, N, C)
    return jnp.max(out, axis=1).reshape(B, G, encoder_channel)


if __name__ == "__main__":
    B, G, N = 2, 2, 32
    ENCODER_CHANNEL = 256

    key = jax.random.PRNGKey(0)
    keys = jax.random.split(key, 17)

    def normal(k, shape, scale):
        return jax.random.normal(k, shape, dtype=jnp.float32) * scale

    params = {
        # Conv1d weights in PyTorch layout (out, in, kernel=1); biases (out,).
        "w1": normal(keys[0], (128, 3, 1), 3 ** -0.5),
        "b1": normal(keys[1], (128,), 0.1),
        "bn1_gamma": 1.0 + 0.1 * jax.random.normal(keys[2], (128,), dtype=jnp.float32),
        "bn1_beta": normal(keys[3], (128,), 0.1),
        "bn1_mean": normal(keys[4], (128,), 0.1),
        "bn1_var": jax.random.uniform(keys[5], (128,), dtype=jnp.float32,
                                      minval=0.5, maxval=1.5),
        "w2": normal(keys[6], (256, 128, 1), 128 ** -0.5),
        "b2": normal(keys[7], (256,), 0.1),
        "w3": normal(keys[8], (512, 512, 1), 512 ** -0.5),
        "b3": normal(keys[9], (512,), 0.1),
        "bn2_gamma": 1.0 + 0.1 * jax.random.normal(keys[10], (512,), dtype=jnp.float32),
        "bn2_beta": normal(keys[11], (512,), 0.1),
        "bn2_mean": normal(keys[12], (512,), 0.1),
        "bn2_var": jax.random.uniform(keys[13], (512,), dtype=jnp.float32,
                                      minval=0.5, maxval=1.5),
        "w4": normal(keys[14], (ENCODER_CHANNEL, 512, 1), 512 ** -0.5),
        "b4": normal(keys[15], (ENCODER_CHANNEL,), 0.1),
    }
    point_groups = jax.random.normal(keys[16], (B, G, N, 3), dtype=jnp.float32)

    out = encoder_forward(point_groups, params,
                          encoder_channel=ENCODER_CHANNEL, groups_per_block=2)
    out = jax.block_until_ready(out)

    ref = reference_forward(point_groups, params, ENCODER_CHANNEL)
    assert out.shape == (B, G, ENCODER_CHANNEL)
    max_diff = jnp.max(jnp.abs(out - ref))
    assert jnp.allclose(out, ref, atol=2e-2, rtol=2e-2), \
        f"mismatch vs reference, max abs diff = {max_diff}"

    # Also exercise the padded / clamped block-size path (BG=4 not divisible by 3).
    out2 = jax.block_until_ready(
        encoder_forward(point_groups, params,
                        encoder_channel=ENCODER_CHANNEL, groups_per_block=3))
    assert jnp.allclose(out2, ref, atol=2e-2, rtol=2e-2), "mismatch on padded path"

    print("KERNEL_OK")
</pallas_src>

<mosaic_0001>
module attributes {stable_mosaic.version = 11 : i64} {
  func.func @_encoder_kernel(%arg0: i32, %arg1: memref<2x32x3xf32, #tpu.memory_space<vmem>>, %arg2: memref<3x128xf32, #tpu.memory_space<vmem>>, %arg3: memref<1x128xf32, #tpu.memory_space<vmem>>, %arg4: memref<128x256xf32, #tpu.memory_space<vmem>>, %arg5: memref<1x256xf32, #tpu.memory_space<vmem>>, %arg6: memref<256x512xf32, #tpu.memory_space<vmem>>, %arg7: memref<256x512xf32, #tpu.memory_space<vmem>>, %arg8: memref<1x512xf32, #tpu.memory_space<vmem>>, %arg9: memref<512x256xf32, #tpu.memory_space<vmem>>, %arg10: memref<1x256xf32, #tpu.memory_space<vmem>>, %arg11: memref<1x2x256xf32, #tpu.memory_space<vmem>>) attributes {dimension_semantics = [#tpu.dimension_semantics<parallel>], iteration_bounds = array<i64: 2>, scalar_prefetch = 0 : i64, scratch_operands = 0 : i64, tpu.core_type = #tpu.core_type<tc>, window_params = [{transform_indices = @transform_0, window_bounds = array<i64: 2, 32, 3>}, {pipeline_mode = #tpu.pipeline_mode<synchronous>, transform_indices = @transform_1, window_bounds = array<i64: 3, 128>}, {pipeline_mode = #tpu.pipeline_mode<synchronous>, transform_indices = @transform_2, window_bounds = array<i64: 1, 128>}, {pipeline_mode = #tpu.pipeline_mode<synchronous>, transform_indices = @transform_3, window_bounds = array<i64: 128, 256>}, {pipeline_mode = #tpu.pipeline_mode<synchronous>, transform_indices = @transform_4, window_bounds = array<i64: 1, 256>}, {pipeline_mode = #tpu.pipeline_mode<synchronous>, transform_indices = @transform_5, window_bounds = array<i64: 256, 512>}, {pipeline_mode = #tpu.pipeline_mode<synchronous>, transform_indices = @transform_6, window_bounds = array<i64: 256, 512>}, {pipeline_mode = #tpu.pipeline_mode<synchronous>, transform_indices = @transform_7, window_bounds = array<i64: 1, 512>}, {pipeline_mode = #tpu.pipeline_mode<synchronous>, transform_indices = @transform_8, window_bounds = array<i64: 512, 256>}, {pipeline_mode = #tpu.pipeline_mode<synchronous>, transform_indices = @transform_9, window_bounds = array<i64: 1, 256>}, {transform_indices = @transform_10, window_bounds = array<i64: 1, 2, 256>}]} {
    %c0 = arith.constant 0 : index
    %c0_0 = arith.constant 0 : index
    %c0_1 = arith.constant 0 : index
    %0 = vector.load %arg1[%c0, %c0_0, %c0_1] : memref<2x32x3xf32, #tpu.memory_space<vmem>>, vector<2x32x3xf32>
    %1 = vector.shape_cast %0 : vector<2x32x3xf32> to vector<64x3xf32>
    %c0_2 = arith.constant 0 : index
    %c0_3 = arith.constant 0 : index
    %2 = vector.load %arg2[%c0_2, %c0_3] : memref<3x128xf32, #tpu.memory_space<vmem>>, vector<3x128xf32>
    %cst = arith.constant dense<0.000000e+00> : vector<64x128xf32>
    %3 = tpu.matmul %1, %2, %cst {dimension_numbers = #tpu.dot_dimension_numbers<[1], [0], [0], [1], [0, 0, 1, 1], [], []>} : vector<64x3xf32>, vector<3x128xf32>, vector<64x128xf32> -> vector<64x128xf32>
    %c0_4 = arith.constant 0 : index
    %c0_5 = arith.constant 0 : index
    %4 = vector.load %arg3[%c0_4, %c0_5] : memref<1x128xf32, #tpu.memory_space<vmem>>, vector<1x128xf32>
    %5 = vector.broadcast %4 : vector<1x128xf32> to vector<64x128xf32>
    %6 = arith.addf %3, %5 : vector<64x128xf32>
    %cst_6 = arith.constant 0.000000e+00 : f32
    %7 = vector.broadcast %cst_6 : f32 to vector<64x128xf32>
    %8 = arith.maximumf %6, %7 : vector<64x128xf32>
    %c0_7 = arith.constant 0 : index
    %c0_8 = arith.constant 0 : index
    %9 = vector.load %arg4[%c0_7, %c0_8] : memref<128x256xf32, #tpu.memory_space<vmem>>, vector<128x256xf32>
    %cst_9 = arith.constant dense<0.000000e+00> : vector<64x256xf32>
    %10 = tpu.matmul %8, %9, %cst_9 {dimension_numbers = #tpu.dot_dimension_numbers<[1], [0], [0], [1], [0, 0, 1, 1], [], []>} : vector<64x128xf32>, vector<128x256xf32>, vector<64x256xf32> -> vector<64x256xf32>
    %c0_10 = arith.constant 0 : index
    %c0_11 = arith.constant 0 : index
    %11 = vector.load %arg5[%c0_10, %c0_11] : memref<1x256xf32, #tpu.memory_space<vmem>>, vector<1x256xf32>
    %12 = vector.broadcast %11 : vector<1x256xf32> to vector<64x256xf32>
    %13 = arith.addf %10, %12 : vector<64x256xf32>
    %14 = vector.shape_cast %13 : vector<64x256xf32> to vector<2x32x256xf32>
    %cst_12 = arith.constant dense<0xFF800000> : vector<2x256xf32>
    %15 = vector.multi_reduction <maximumf>, %14, %cst_12 [1] : vector<2x32x256xf32> to vector<2x256xf32>
    %c0_13 = arith.constant 0 : index
    %c0_14 = arith.constant 0 : index
    %16 = vector.load %arg6[%c0_13, %c0_14] : memref<256x512xf32, #tpu.memory_space<vmem>>, vector<256x512xf32>
    %cst_15 = arith.constant dense<0.000000e+00> : vector<2x512xf32>
    %17 = tpu.matmul %15, %16, %cst_15 {dimension_numbers = #tpu.dot_dimension_numbers<[1], [0], [0], [1], [0, 0, 1, 1], [], []>} : vector<2x256xf32>, vector<256x512xf32>, vector<2x512xf32> -> vector<2x512xf32>
    %c0_16 = arith.constant 0 : index
    %c0_17 = arith.constant 0 : index
    %18 = vector.load %arg7[%c0_16, %c0_17] : memref<256x512xf32, #tpu.memory_space<vmem>>, vector<256x512xf32>
    %cst_18 = arith.constant dense<0.000000e+00> : vector<64x512xf32>
    %19 = tpu.matmul %13, %18, %cst_18 {dimension_numbers = #tpu.dot_dimension_numbers<[1], [0], [0], [1], [0, 0, 1, 1], [], []>} : vector<64x256xf32>, vector<256x512xf32>, vector<64x512xf32> -> vector<64x512xf32>
    %20 = vector.shape_cast %19 : vector<64x512xf32> to vector<2x32x512xf32>
    %21 = vector.shape_cast %17 : vector<2x512xf32> to vector<2x1x512xf32>
    %22 = vector.broadcast %21 : vector<2x1x512xf32> to vector<2x32x512xf32>
    %23 = arith.addf %20, %22 : vector<2x32x512xf32>
    %c0_19 = arith.constant 0 : index
    %c0_20 = arith.constant 0 : index
    %24 = vector.load %arg8[%c0_19, %c0_20] : memref<1x512xf32, #tpu.memory_space<vmem>>, vector<1x512xf32>
    %25 = vector.shape_cast %24 : vector<1x512xf32> to vector<1x1x512xf32>
    %26 = vector.broadcast %25 : vector<1x1x512xf32> to vector<2x32x512xf32>
    %27 = arith.addf %23, %26 : vector<2x32x512xf32>
    %cst_21 = arith.constant 0.000000e+00 : f32
    %28 = vector.broadcast %cst_21 : f32 to vector<2x32x512xf32>
    %29 = arith.maximumf %27, %28 : vector<2x32x512xf32>
    %30 = vector.shape_cast %29 : vector<2x32x512xf32> to vector<64x512xf32>
    %c0_22 = arith.constant 0 : index
    %c0_23 = arith.constant 0 : index
    %31 = vector.load %arg9[%c0_22, %c0_23] : memref<512x256xf32, #tpu.memory_space<vmem>>, vector<512x256xf32>
    %cst_24 = arith.constant dense<0.000000e+00> : vector<64x256xf32>
    %32 = tpu.matmul %30, %31, %cst_24 {dimension_numbers = #tpu.dot_dimension_numbers<[1], [0], [0], [1], [0, 0, 1, 1], [], []>} : vector<64x512xf32>, vector<512x256xf32>, vector<64x256xf32> -> vector<64x256xf32>
    %c0_25 = arith.constant 0 : index
    %c0_26 = arith.constant 0 : index
    %33 = vector.load %arg10[%c0_25, %c0_26] : memref<1x256xf32, #tpu.memory_space<vmem>>, vector<1x256xf32>
    %34 = vector.broadcast %33 : vector<1x256xf32> to vector<64x256xf32>
    %35 = arith.addf %32, %34 : vector<64x256xf32>
    %36 = vector.shape_cast %35 : vector<64x256xf32> to vector<2x32x256xf32>
    %cst_27 = arith.constant dense<0xFF800000> : vector<2x256xf32>
    %37 = vector.multi_reduction <maximumf>, %36, %cst_27 [1] : vector<2x32x256xf32> to vector<2x256xf32>
    %c0_28 = arith.constant 0 : index
    %c0_29 = arith.constant 0 : index
    %c0_30 = arith.constant 0 : index
    %38 = vector.load %arg11[%c0_28, %c0_29, %c0_30] : memref<1x2x256xf32, #tpu.memory_space<vmem>>, vector<1x2x256xf32>
    %39 = vector.shape_cast %38 : vector<1x2x256xf32> to vector<2x256xf32>
    %40 = vector.shape_cast %37 : vector<2x256xf32> to vector<1x2x256xf32>
    tpu.vector_store %arg11[%c0_28, %c0_29, %c0_30], %40 {strides = array<i32>} : memref<1x2x256xf32, #tpu.memory_space<vmem>>, vector<1x2x256xf32>,
    return
  }
  func.func @transform_0(%arg0: i32) -> (i32, i32, i32) {
    %c0_i32 = arith.constant 0 : i32
    %c0_i32_0 = arith.constant 0 : i32
    %c0_i32_1 = arith.constant 0 : i32
    return %arg0, %c0_i32, %c0_i32_0 : i32, i32, i32
  }
  func.func @transform_1(%arg0: i32) -> (i32, i32) {
    %c0_i32 = arith.constant 0 : i32
    %c0_i32_0 = arith.constant 0 : i32
    %c0_i32_1 = arith.constant 0 : i32
    return %c0_i32, %c0_i32_0 : i32, i32
  }
  func.func @transform_2(%arg0: i32) -> (i32, i32) {
    %c0_i32 = arith.constant 0 : i32
    %c0_i32_0 = arith.constant 0 : i32
    %c0_i32_1 = arith.constant 0 : i32
    return %c0_i32, %c0_i32_0 : i32, i32
  }
  func.func @transform_3(%arg0: i32) -> (i32, i32) {
    %c0_i32 = arith.constant 0 : i32
    %c0_i32_0 = arith.constant 0 : i32
    %c0_i32_1 = arith.constant 0 : i32
    return %c0_i32, %c0_i32_0 : i32, i32
  }
  func.func @transform_4(%arg0: i32) -> (i32, i32) {
    %c0_i32 = arith.constant 0 : i32
    %c0_i32_0 = arith.constant 0 : i32
    %c0_i32_1 = arith.constant 0 : i32
    return %c0_i32, %c0_i32_0 : i32, i32
  }
  func.func @transform_5(%arg0: i32) -> (i32, i32) {
    %c0_i32 = arith.constant 0 : i32
    %c0_i32_0 = arith.constant 0 : i32
    %c0_i32_1 = arith.constant 0 : i32
    return %c0_i32, %c0_i32_0 : i32, i32
  }
  func.func @transform_6(%arg0: i32) -> (i32, i32) {
    %c0_i32 = arith.constant 0 : i32
    %c0_i32_0 = arith.constant 0 : i32
    %c0_i32_1 = arith.constant 0 : i32
    return %c0_i32, %c0_i32_0 : i32, i32
  }
  func.func @transform_7(%arg0: i32) -> (i32, i32) {
    %c0_i32 = arith.constant 0 : i32
    %c0_i32_0 = arith.constant 0 : i32
    %c0_i32_1 = arith.constant 0 : i32
    return %c0_i32, %c0_i32_0 : i32, i32
  }
  func.func @transform_8(%arg0: i32) -> (i32, i32) {
    %c0_i32 = arith.constant 0 : i32
    %c0_i32_0 = arith.constant 0 : i32
    %c0_i32_1 = arith.constant 0 : i32
    return %c0_i32, %c0_i32_0 : i32, i32
  }
  func.func @transform_9(%arg0: i32) -> (i32, i32) {
    %c0_i32 = arith.constant 0 : i32
    %c0_i32_0 = arith.constant 0 : i32
    %c0_i32_1 = arith.constant 0 : i32
    return %c0_i32, %c0_i32_0 : i32, i32
  }
  func.func @transform_10(%arg0: i32) -> (i32, i32, i32) {
    %c0_i32 = arith.constant 0 : i32
    %c0_i32_0 = arith.constant 0 : i32
    %c0_i32_1 = arith.constant 0 : i32
    return %arg0, %c0_i32, %c0_i32_0 : i32, i32, i32
  }
}

</mosaic_0001>

<bundles_post_ra>
// kernel: tpu_custom_call.1
= control target key start
LH: loop header
LB: loop body
LE: loop exit
PB: predicated region body
PF: predicated region fallthrough
CT: control target
= control target key end

     0   :  { %s3464_s0 = inlined_call_operand.vmem [shape: f32[4,32,3], index: 0, kind: input, shape index: {}]   ;;  %s3465_s1 = inlined_call_operand.vmem [shape: f32[3,128], index: 1, kind: input, shape index: {}]   ;;  %s3466_s2 = inlined_call_operand.vmem [shape: f32[1,128], index: 2, kind: input, shape index: {}]   ;;  %s3467_s3 = inlined_call_operand.hbm [shape: f32[128,256], index: 3, kind: input, shape index: {}]   ;;  %s3468_s4 = inlined_call_operand.vmem [shape: f32[1,256], index: 4, kind: input, shape index: {}]   ;;  %s3469_s5 = inlined_call_operand.hbm [shape: f32[256,512], index: 5, kind: input, shape index: {}]   ;;  %s3470_s6 = inlined_call_operand.hbm [shape: f32[256,512], index: 6, kind: input, shape index: {}]   ;;  %s3471_s7 = inlined_call_operand.vmem [shape: f32[1,512], index: 7, kind: input, shape index: {}]   ;;  %s3472_s8 = inlined_call_operand.hbm [shape: f32[512,256], index: 8, kind: input, shape index: {}]   ;;  %s3473_s9 = inlined_call_operand.vmem [shape: f32[1,256], index: 9, kind: input, shape index: {}]   ;;  %s3474_s10 = inlined_call_operand.hbm [shape: f32[2,2,256], index: 10, kind: output, shape index: {}]  }
   0x1   :  { %3486 = sst [smem:[#allocation20_spill]] %s3469_s5 }
   0x2   :  { %15 = vsyncpa [#allocation3], 0 }
   0x3   :  { %16 = vsyncpa [#allocation6], 0 }
   0x4   :  { %17 = vsyncpa [#allocation9], 0 }
   0x5   :  { %18 = vsyncpa [#allocation4], 0 }
   0x6   :  { %20 = vsyncpa [#allocation4 + $0x1], 0  ;;  %s2997_s13 = smov 0   ;;  %s2999_s14 = smov 0  }
   0x7   :  { %s3001_s15 = smov 0   ;;  %s3003_s16 = smov 0  }
   0x8 LB: > { %3487 = sst [smem:[#allocation15_spill]] %s2916_s13  ;;  %s3018_s17 = sadd.s32 4294967295, %s2928_s16   ;;  %s2928_s16 = sphi %s3003_s16, %s3512_s16   ;;  %s2924_s15 = sphi %s3001_s15, %s3514_s15   ;;  %s2920_s14 = sphi %s2999_s14, %s3516_s14   ;;  %s2916_s13 = sphi %s2997_s13, %s3515_s13  }
   0x9   : > { %3488 = sst [smem:[#allocation16_spill]] %s2924_s15  ;;  %s2151_s18 = sadd.s32 4294967294, %s2928_s16  }
   0xa   : > { %s3022_s19 = sadd.s32 1, %s2928_s16   ;;  %s248_s20 = sadd.s32 1, %s2924_s15 }
   0xb   : > { %3489 = sst [smem:[#allocation17_spill]] %s3022_s19  ;;  %s245_s21 = ssub.s32 %s2928_s16, %s3022_s19 }
   0xc   : > { %p258_p0 = scmp.ne.s32.totalorder %s2924_s15, %s2920_s14  ;;  %p246_p1 = scmp.eq.s32.totalorder %s245_s21, 0 }
   0xd   : > { %p259_p2 = scmp.eq.s32.totalorder %s3018_s17, 1  ;;  %p264_p3 = scmp.ne.s32.totalorder %s2920_s14, %s2916_s13 }
   0xe   : > { %p265_p4 = scmp.eq.s32.totalorder %s2151_s18, 1  ;;  %p2152_p7 = scmp.ge.s32.totalorder %s2928_s16, 1 }
   0xf   : > { %s3033_s22 = scalar_select %p246_p1, %s2924_s15, %s248_s20  }
  0x10   : > { %p3035_p5 = por %p259_p2, %p258_p0  ;;  %p3039_p6 = por %p265_p4, %p264_p3 }
  0x11   : > { %3490 = sst [smem:[#allocation18_spill]] %s3033_s22  ;;  %p272_p8 = scmp.lt.s32.totalorder %s2928_s16, 3 }
  0x12   : > { %s3491_s23 = scalar_select %p3035_p5, 1, 0 }
  0x13   : > { %s3492_s24 = scalar_select %p3039_p6, 1, 0 }
  0x14   : > { %p3475_p9 = scmp.eq.s32.totalorder %s3018_s17, 0  ;;  %p3046_p10 = pnand %p2152_p7, %p272_p8 }
  0x15   : > { %3493 = sst [smem:[#allocation19_spill]] %s3492_s24  ;;  %s2930_s26 = smov [#allocation5]  }
  0x16   : > { %s3494_s25 = scalar_select %p3046_p10, 1, 0 }
  0x17   : > { %s306_s27 = sshll.u32 %s2930_s26, 4  ;;  %p2673_p11 = pneg %p3046_p10  ;;  %s307_s27 = int_to_ptr.vmem [resolvable:$true] %s306_s27 }
  0x18   : > { %s2931_s29 = smov [#allocation2]   ;;  %s3496_s5 = sld [smem:[#allocation20_spill]] }
  0x19   : > { %p3054_p12 = pnand %p3475_p9, %p2673_p11  ;;  %s290_s30 = sshll.u32 %s2931_s29, 4  ;;  %s3058_s30 = int_to_ptr.vmem [resolvable:$true] %s290_s30 }
  0x1b   : > { %p3068_p0 = pneg %p3054_p12 }
  0x1e   : > { %s2742_s18 = scalar_lea.hbm %s3496_s5, 16384 }
  0x1f   : > { %p2743_p13 = scmp.ne.s32.totalorder %s3496_s5, %s2742_s18  ;;  %p2749_p3 = scmp.lt.u32.totalorder %s2742_s18, %s3496_s5 }
  0x21   : > { %p2745_p1 = pnand %p3068_p0, %p2743_p13 }
  0x23   : > { %p2746_p2 = pneg %p2745_p1 }
  0x25   : > { %p2751_p4 = pnand %p2749_p3, %p2746_p2 }
  0x27   : > { %2754 = shalt.err (!%p2751_p4)
}
  0x28   : > { %s2755_s11 = scalar_lea.vmem %s307_s27, 16384  ;;  %p2763_p9 = scmp.lt.s32.totalorder %s307_s27, %s307_s27 }
  0x29   : > { %p2756_p7 = scmp.ne.s32.totalorder %s307_s27, %s2755_s11  ;;  %p2764_p6 = scmp.lt.s32.totalorder %s2755_s11, %s2755_s11 }
  0x2b   : > { %p2758_p8 = pnand %p2756_p7, %p3068_p0  ;;  %p2765_p5 = por %p2764_p6, %p2763_p9 }
  0x2d   : > { %p2759_p11 = pneg %p2758_p8 }
  0x2f   : > { %p2766_p10 = pnand %p2765_p5, %p2759_p11 }
  0x31   : > { %2769 = shalt.err (!%p2766_p10)
}
  0x32   : > { %s3483_s12 = smov 512   ;;  %s3484_s20 = smov 32  }
  0x33   : > { %2679 = dma.hbm_to_vmem [thread:$0]  (!%p3054_p12), %s3496_s5, 16384, %s307_s27, [#allocation6], %s3483_s12, %s3483_s12, %s3484_s20  }
  0x34   : > { %s2770_s15 = scalar_lea.hbm %s3467_s3, 4096 }
  0x35   : > { %p2771_p5 = scmp.ne.s32.totalorder %s3467_s3, %s2770_s15  ;;  %p2777_p10 = scmp.lt.u32.totalorder %s2770_s15, %s3467_s3 }
  0x37   : > { %p2773_p6 = pnand %p2771_p5, %p3068_p0 }
  0x39   : > { %p2774_p9 = pneg %p2773_p6 }
  0x3b   : > { %p2779_p13 = pnand %p2777_p10, %p2774_p9 }
  0x3d   : > { %2782 = shalt.err (!%p2779_p13)
}
  0x3e   : > { %s2783_s27 = scalar_lea.vmem %s3058_s30, 4096  ;;  %p2791_p4 = scmp.lt.s32.totalorder %s3058_s30, %s3058_s30 }
  0x3f   : > { %p2784_p1 = scmp.ne.s32.totalorder %s3058_s30, %s2783_s27  ;;  %p2792_p7 = scmp.lt.s32.totalorder %s2783_s27, %s2783_s27 }
  0x41   : > { %p2786_p2 = pnand %p2784_p1, %p3068_p0  ;;  %p2793_p8 = por %p2792_p7, %p2791_p4 }
  0x43   : > { %p2787_p3 = pneg %p2786_p2 }
  0x45   : > { %p2794_p11 = pnand %p2793_p8, %p2787_p3 }
  0x47   : > { %2797 = shalt.err (!%p2794_p11)
}
  0x48   : > { %s3485_s19 = smov 256   ;;  %s2935_s13 = smov 16  }
  0x49   : > { %2676 = dma.hbm_to_vmem [thread:$0]  (!%p3054_p12), %s3467_s3, 4096, %s3058_s30, [#allocation3], %s3485_s19, %s3485_s19, %s2935_s13  }
  0x4a   : > { %s2936_s22 = smov [#allocation7]   ;;  %s2937_s21 = smov [#allocation8]  }
  0x4b   : > { %s319_s18 = sshll.u32 %s2936_s22, 4  ;;  %s335_s29 = sshll.u32 %s2937_s21, 4  ;;  %s320_s18 = int_to_ptr.vmem [resolvable:$true] %s319_s18  ;;  %s3113_s29 = int_to_ptr.vmem [resolvable:$true] %s335_s29 }
  0x4c   : > { %s2798_s12 = scalar_lea.hbm %s3470_s6, 16384 }
  0x4d   : > { %p2799_p5 = scmp.ne.s32.totalorder %s3470_s6, %s2798_s12  ;;  %p2805_p10 = scmp.lt.u32.totalorder %s2798_s12, %s3470_s6 }
  0x4f   : > { %p2801_p6 = pnand %p2799_p5, %p3068_p0 }
  0x51   : > { %p2802_p9 = pneg %p2801_p6 }
  0x53   : > { %p2807_p13 = pnand %p2805_p10, %p2802_p9 }
  0x55   : > { %2810 = shalt.err (!%p2807_p13)
}
  0x56   : > { %s2811_s24 = scalar_lea.vmem %s320_s18, 16384  ;;  %p2819_p4 = scmp.lt.s32.totalorder %s320_s18, %s320_s18 }
  0x57   : > { %p2812_p1 = scmp.ne.s32.totalorder %s320_s18, %s2811_s24  ;;  %p2820_p7 = scmp.lt.s32.totalorder %s2811_s24, %s2811_s24 }
  0x59   : > { %p2814_p2 = pnand %p2812_p1, %p3068_p0  ;;  %p2821_p8 = por %p2820_p7, %p2819_p4 }
  0x5b   : > { %p2815_p3 = pneg %p2814_p2 }
  0x5d   : > { %p2822_p11 = pnand %p2821_p8, %p2815_p3 }
  0x5f   : > { %2825 = shalt.err (!%p2822_p11)
}
  0x60   : > { %s3498_s5 = smov 32   ;;  %s3499_s20 = smov 512  }
  0x61   : > { %2682 = dma.hbm_to_vmem [thread:$0]  (!%p3054_p12), %s3470_s6, 16384, %s320_s18, [#allocation6], %s3499_s20, %s3499_s20, %s3498_s5  }
  0x62   : > { %s2826_s27 = scalar_lea.hbm %s3472_s8, 16384 }
  0x63   : > { %p2827_p5 = scmp.ne.s32.totalorder %s3472_s8, %s2826_s27  ;;  %p2833_p10 = scmp.lt.u32.totalorder %s2826_s27, %s3472_s8 }
  0x65   : > { %p2829_p6 = pnand %p2827_p5, %p3068_p0 }
  0x67   : > { %p2830_p9 = pneg %p2829_p6 }
  0x69   : > { %p2835_p13 = pnand %p2833_p10, %p2830_p9 }
  0x6b   : > { %2838 = shalt.err (!%p2835_p13)
}
  0x6c   : > { %s2839_s18 = scalar_lea.vmem %s3113_s29, 16384  ;;  %p2847_p4 = scmp.lt.s32.totalorder %s3113_s29, %s3113_s29 }
  0x6d   : > { %p2840_p1 = scmp.ne.s32.totalorder %s3113_s29, %s2839_s18  ;;  %p2848_p7 = scmp.lt.s32.totalorder %s2839_s18, %s2839_s18 }
  0x6f   : > { %p2842_p2 = pnand %p2840_p1, %p3068_p0  ;;  %p2849_p8 = por %p2848_p7, %p2847_p4 }
  0x71   : > { %p2843_p3 = pneg %p2842_p2 }
  0x73   : > { %p2850_p11 = pnand %p2849_p8, %p2843_p3 }
  0x75   : > { %2853 = shalt.err (!%p2850_p11)
}
  0x76   : > { %s3500_s19 = smov 256   ;;  %p3501_p5 = scmp.ne.s32.totalorder %s3494_s25, 0 }
  0x77   : > { %2685 = dma.hbm_to_vmem [thread:$0]  (!%p3054_p12), %s3472_s8, 16384, %s3113_s29, [#allocation9], %s3500_s19, %s3500_s19, %s2935_s13  }
  0x78   : > { %364 = sbr.rel (%p3501_p5) target bundleno = 1257 (0x4e9), region = 60  ;;  %p3502_p0 = scmp.eq.s32.totalorder (!%p3501_p5), %s3018_s17, 0 }
  0x7f   : > { %2899 = dma.done.wait (%p3502_p0), [#allocation3], 4096   ;;  %p3503_p6 = pmov %p3502_p0 }
  0x80   : > { %p3504_p9 = pmov %p3502_p0 }
  0x81   : > { %2901 = vsyncadd (%p3503_p6), [#allocation3], 4294963200 }
  0x82   : > { %2903 = dma.done.wait (%p3504_p9), [#allocation6], 32768   ;;  %p3505_p10 = pmov %p3502_p0 }
  0x83   : > { %p3506_p13 = pmov %p3502_p0 }
  0x84   : > { %2905 = vsyncadd (%p3505_p10), [#allocation6], 4294934528 }
  0x85   : > { %2907 = dma.done.wait (%p3506_p13), [#allocation9], 16384   ;;  %p3507_p12 = pmov %p3502_p0 }
  0x86   : > { %s2164_s25 = sshll.u32 %s3018_s17, 1  ;;  %vm463_vm0 = vcmask 1042432   ;;  %vm438_vm1 = vcmask 23552   ;;  %v430_v0 = vld [vmem:[%s3465_s1] sm:$0x7]  ;;  %v581_v6 = vld [vmem:[#allocation2 + $0x8] sm:$0xff] }
  0x87   : > { %2909 = vsyncadd (%p3507_p12), [#allocation9], 4294950912  ;;  %p416_p1 = scmp.lt.s32.totalorder %s2164_s25, 3  ;;  %2193 = vmatprep.subr.msk.mxu0 %vm463_vm0, %v430_v0  ;;  %v583_v7 = vld [vmem:[#allocation2 + $0x18] sm:$0xff]  ;;  %v580_v8 = vld [vmem:[#allocation2] sm:$0xff]  ;;  %v2938_v57 = vmov 0.0  }
  0x88   : > { %2194 = vmatpush3.msk.msra.mxu0 %vm463_vm0, %v430_v0  ;;  %v2207_v9 = vpack.c.bf16 %v583_v7, %v581_v6  ;;  %v582_v10 = vld [vmem:[#allocation2 + $0x10] sm:$0xff]  ;;  %v585_v11 = vld [vmem:[#allocation2 + $0x28] sm:$0xff]  ;;  %v587_v12 = vld [vmem:[#allocation2 + $0x38] sm:$0xff]  ;;  %688 = vmatprep.mubr.f32.mxu1 %v2938_v57  ;;  %vm905_vm2 = vcmask 1041409   ;;  %s412_s5 = sand.u32 1, %s2920_s14   ;;  %vm2028_vm3 = vcmask 1043459  }
  0x89   : > { %s3518_s25 = smov (!%p416_p1, %s2164_s25), 3  ;;  %v2209_v13 = vpack.c.bf16 %v582_v10, %v580_v8  ;;  %v2211_v14 = vpack.c.bf16 %v587_v12, %v585_v11  ;;  %v584_v15 = vld [vmem:[#allocation2 + $0x20] sm:$0xff]  ;;  %v586_v16 = vld [vmem:[#allocation2 + $0x30] sm:$0xff]  ;;  %v589_v17 = vld [vmem:[#allocation2 + $0x48] sm:$0xff]  ;;  %s2163_s20 = sshll.u32 %s412_s5, 2  ;;  %vm2030_vm4 = vcmask 1045509  }
  0x8a   : > { %s2182_s28 = sshll.u32 %s3518_s25, 5  ;;  %2208 = vmatprep.subr.bf16.mxu1 %v2207_v9  ;;  %v591_v18 = vld [vmem:[#allocation2 + $0x58] sm:$0xff]  ;;  %v2213_v19 = vpack.c.bf16 %v586_v16, %v584_v15  ;;  %v588_v22 = vld [vmem:[#allocation2 + $0x40] sm:$0xff]  ;;  %v590_v23 = vld [vmem:[#allocation2 + $0x50] sm:$0xff]  ;;  %s2183_s25 = sshll.u32 %s3018_s17, 6  ;;  %vm2032_vm5 = vcmask 1047559  }
  0x8b   : > { %s3180_s29 = scalar_lea.vmem %s3464_s0, %s2182_s28  ;;  %2210 = vmatpush1.bf16.msra.mxu1 %v2209_v13  ;;  %v2215_v21 = vpack.c.bf16 %v591_v18, %v589_v17  ;;  %v593_v25 = vld [vmem:[#allocation2 + $0x68] sm:$0xff]  ;;  %v595_v26 = vld [vmem:[#allocation2 + $0x78] sm:$0xff]  ;;  %v2217_v27 = vpack.c.bf16 %v590_v23, %v588_v22  ;;  %v592_v30 = vld [vmem:[#allocation2 + $0x60] sm:$0xff]  ;;  %s414_s28 = scalar_lea.vmem [#allocation10], %s2163_s20 }
  0x8c   : > { %v422_v1 = vld [vmem:[%s3180_s29] sm:$0xff]  ;;  %v423_v2 = vld [vmem:[%s3180_s29 + $0x8] sm:$0xff]  ;;  %v424_v3 = vld [vmem:[%s3180_s29 + $0x10] sm:$0xff]  ;;  %2212 = vmatprep.subr.bf16.mxu1 %v2211_v14  ;;  %v2219_v29 = vpack.c.bf16 %v595_v26, %v593_v25  ;;  %s2051_s26 = sshll.u32 %s414_s28, 4  ;;  %s3422_s22 = scalar_lea.hbm %s3474_s10, %s2183_s25  ;;  %s3424_s26 = int_to_ptr.vmem [resolvable:$true] %s2051_s26 }
  0x8d   : > { %2195 = vmatprep.mubr.msk.f32.mxu0 %vm438_vm1, %v422_v1  ;;  %v425_v4 = vld [vmem:[%s3180_s29 + $0x18] sm:$0xff]  ;;  %v426_v5 = vld [vmem:[%s3180_s29 + $0x20] sm:$0xff]  ;;  %v427_v20 = vld [vmem:[%s3180_s29 + $0x28] sm:$0xff]  ;;  %s2037_s17 = scalar_lea.sflag [#allocation4], %s412_s5  ;;  %s2854_s12 = scalar_lea.vmem %s3424_s26, 64 }
  0x8e   : > { %2196 = vmatmul.mubr.msk.f32.vlgmr.msra.gmra.mrb[0].mxu0 %vm438_vm1, %v423_v2  ;;  %v428_v24 = vld [vmem:[%s3180_s29 + $0x30] sm:$0xff]  ;;  %v429_v28 = vld [vmem:[%s3180_s29 + $0x38] sm:$0xff]  ;;  %v597_v32 = vld [vmem:[#allocation2 + $0x88] sm:$0xff]  ;;  %p2855_p2 = scmp.ne.s32.totalorder %s3424_s26, %s2854_s12  ;;  %p3508_p3 = scmp.ne.s32.totalorder %s3491_s23, 0 }
  0x8f   : > { %2198 = vmatprep.mubr.msk.f32.mxu0 %vm438_vm1, %v424_v3  ;;  %2214 = vmatpush1.bf16.msra.mxu1 %v2213_v19  ;;  %v594_v31 = vld [vmem:[#allocation2 + $0x70] sm:$0xff]  ;;  %v599_v33 = vld [vmem:[#allocation2 + $0x98] sm:$0xff]  ;;  %v596_v36 = vld [vmem:[#allocation2 + $0x80] sm:$0xff]  ;;  %s2941_s21 = smov [#allocation10]  }
  0x90   : > { %2216 = vmatprep.subr.bf16.mxu1 %v2215_v21  ;;  %v2221_v34 = vpack.c.bf16 %v594_v31, %v592_v30  ;;  %v2223_v35 = vpack.c.bf16 %v599_v33, %v597_v32  ;;  %v598_v37 = vld [vmem:[#allocation2 + $0x90] sm:$0xff]  ;;  %v601_v38 = vld [vmem:[#allocation2 + $0xa8] sm:$0xff]  ;;  %v603_v39 = vld [vmem:[#allocation2 + $0xb8] sm:$0xff]  ;;  %p2856_p4 = pnand %p2855_p2, %p3508_p3  ;;  %s2858_s11 = sshll.u32 %s2941_s21, 4  ;;  %s2859_s11 = int_to_ptr.vmem [resolvable:$false] %s2858_s11 }
  0x91   : > { %v2225_v40 = vpack.c.bf16 %v598_v37, %v596_v36  ;;  %v2227_v41 = vpack.c.bf16 %v603_v39, %v601_v38  ;;  %v600_v42 = vld [vmem:[#allocation2 + $0xa0] sm:$0xff]  ;;  %v602_v43 = vld [vmem:[#allocation2 + $0xb0] sm:$0xff]  ;;  %v605_v44 = vld [vmem:[#allocation2 + $0xc8] sm:$0xff]  ;;  %s2860_s27 = scalar_lea.vmem %s2859_s11, 128  ;;  %p2861_p8 = scmp.lt.s32.totalorder %s3424_s26, %s2859_s11 }
  0x92   : > { %2199 = vmatmul.mubr.msk.f32.gmra.mrb[2].mxu0 %vm438_vm1, %v425_v4  ;;  %v607_v45 = vld [vmem:[#allocation2 + $0xd8] sm:$0xff]  ;;  %v2229_v46 = vpack.c.bf16 %v602_v43, %v600_v42  ;;  %v604_v48 = vld [vmem:[#allocation2 + $0xc0] sm:$0xff]  ;;  %v606_v49 = vld [vmem:[#allocation2 + $0xd0] sm:$0xff]  ;;  %p2857_p7 = pneg %p2856_p4  ;;  %p2862_p11 = scmp.lt.s32.totalorder %s2860_s27, %s2854_s12 }
  0x93   : > { %2201 = vmatprep.mubr.msk.f32.mxu0 %vm438_vm1, %v426_v5  ;;  %2218 = vmatpush1.bf16.msra.mxu1 %v2217_v27  ;;  %v2231_v47 = vpack.c.bf16 %v607_v45, %v605_v44  ;;  %v2233_v50 = vpack.c.bf16 %v606_v49, %v604_v48  ;;  %v609_v51 = vld [vmem:[#allocation2 + $0xe8] sm:$0xff]  ;;  %v611_v52 = vld [vmem:[#allocation2 + $0xf8] sm:$0xff]  ;;  %v608_v54 = vld [vmem:[#allocation2 + $0xe0] sm:$0xff] }
  0x94   : > { %2220 = vmatprep.subr.bf16.mxu1 %v2219_v29  ;;  %v2235_v53 = vpack.c.bf16 %v611_v52, %v609_v51  ;;  %v610_v55 = vld [vmem:[#allocation2 + $0xf0] sm:$0xff]  ;;  %v1053_v58 = vld [vmem:[#allocation7 + $0x8] sm:$0xff]  ;;  %v1052_v60 = vld [vmem:[#allocation7] sm:$0xff]  ;;  %p2863_p5 = por %p2862_p11, %p2861_p8 }
  0x95   : > { %v2237_v56 = vpack.c.bf16 %v610_v55, %v608_v54  ;;  %v1057_v59 = vld [vmem:[#allocation7 + $0x28] sm:$0xff]  ;;  %v1056_v62 = vld [vmem:[#allocation7 + $0x20] sm:$0xff] }
  0x96   : > { %2202 = vmatmul.mubr.msk.f32.gmra.mrb[4].mxu0 %vm438_vm1, %v427_v20  ;;  %v2367_v61 = vpack.c.bf16 %v1057_v59, %v1053_v58  ;;  %v1061_v63 = vld [vmem:[#allocation7 + $0x48] sm:$0xff]  ;;  %v2369_v1 = vpack.c.bf16 %v1056_v62, %v1052_v60  ;;  %v1060_v3 = vld [vmem:[#allocation7 + $0x40] sm:$0xff]  ;;  %p2864_p0 = pnand %p2863_p5, %p2857_p7 }
  0x97   : > { %2204 = vmatprep.mubr.msk.f32.mxu0 %vm438_vm1, %v428_v24  ;;  %2222 = vmatpush1.bf16.msra.mxu1 %v2221_v34  ;;  %v1065_v0 = vld [vmem:[#allocation7 + $0x68] sm:$0xff]  ;;  %v1064_v4 = vld [vmem:[#allocation7 + $0x60] sm:$0xff] }
  0x98   : > { %2224 = vmatprep.subr.bf16.mxu1 %v2223_v35  ;;  %v2371_v2 = vpack.c.bf16 %v1065_v0, %v1061_v63  ;;  %v1069_v5 = vld [vmem:[#allocation7 + $0x88] sm:$0xff]  ;;  %2368 = vmatprep.subr.bf16.mxu0 %v2367_v61  ;;  %v2373_v7 = vpack.c.bf16 %v1064_v4, %v1060_v3  ;;  %v1068_v9 = vld [vmem:[#allocation7 + $0x80] sm:$0xff] }
  0x99   : > { %v1073_v6 = vld [vmem:[#allocation7 + $0xa8] sm:$0xff]  ;;  %2370 = vmatpush1.bf16.msra.mxu0 %v2369_v1  ;;  %v1072_v10 = vld [vmem:[#allocation7 + $0xa0] sm:$0xff] }
  0x9a   : > { %2205 = vmatmul.mubr.msk.f32.gmra.mrb[6].mxu0 %vm438_vm1, %v429_v28  ;;  %2372 = vmatprep.subr.bf16.mxu0 %v2371_v2  ;;  %v2375_v8 = vpack.c.bf16 %v1073_v6, %v1069_v5  ;;  %v1077_v11 = vld [vmem:[#allocation7 + $0xc8] sm:$0xff]  ;;  %v2377_v13 = vpack.c.bf16 %v1072_v10, %v1068_v9  ;;  %v1076_v15 = vld [vmem:[#allocation7 + $0xc0] sm:$0xff] }
  0x9b   : > { %2226 = vmatpush1.bf16.msra.mxu1 %v2225_v40  ;;  %v1081_v12 = vld [vmem:[#allocation7 + $0xe8] sm:$0xff]  ;;  %v1080_v16 = vld [vmem:[#allocation7 + $0xe0] sm:$0xff] }
  0x9c   : > { %2228 = vmatprep.subr.bf16.mxu1 %v2227_v41  ;;  %v2379_v14 = vpack.c.bf16 %v1081_v12, %v1077_v11  ;;  %v1085_v17 = vld [vmem:[#allocation7 + $0x108] sm:$0xff]  ;;  %v2381_v19 = vpack.c.bf16 %v1080_v16, %v1076_v15  ;;  %v1084_v21 = vld [vmem:[#allocation7 + $0x100] sm:$0xff] }
  0x9d   : > { %2374 = vmatpush1.bf16.msra.mxu0 %v2373_v7  ;;  %v1089_v18 = vld [vmem:[#allocation7 + $0x128] sm:$0xff]  ;;  %v1088_v22 = vld [vmem:[#allocation7 + $0x120] sm:$0xff] }
  0x9e   : > { %2376 = vmatprep.subr.bf16.mxu0 %v2375_v8  ;;  %v2383_v20 = vpack.c.bf16 %v1089_v18, %v1085_v17  ;;  %v1093_v23 = vld [vmem:[#allocation7 + $0x148] sm:$0xff]  ;;  %v2385_v27 = vpack.c.bf16 %v1088_v22, %v1084_v21  ;;  %v1092_v30 = vld [vmem:[#allocation7 + $0x140] sm:$0xff] }
  0x9f   : > { %2230 = vmatpush1.bf16.msra.mxu1 %v2229_v46  ;;  %v1097_v24 = vld [vmem:[#allocation7 + $0x168] sm:$0xff]  ;;  %v1096_v31 = vld [vmem:[#allocation7 + $0x160] sm:$0xff] }
  0xa0   : > { %2232 = vmatprep.subr.bf16.mxu1 %v2231_v47  ;;  %v774_v25 = vld [vmem:[#allocation5 + $0x8] sm:$0xff]  ;;  %v2387_v29 = vpack.c.bf16 %v1097_v24, %v1093_v23  ;;  %v2389_v34 = vpack.c.bf16 %v1096_v31, %v1092_v30  ;;  %v1100_v36 = vld [vmem:[#allocation7 + $0x180] sm:$0xff] }
  0xa1   : > { %2378 = vmatpush1.bf16.msra.mxu0 %v2377_v13  ;;  %v778_v26 = vld [vmem:[#allocation5 + $0x28] sm:$0xff]  ;;  %v1104_v37 = vld [vmem:[#allocation7 + $0x1a0] sm:$0xff] }
  0xa2   : > { %2380 = vmatprep.subr.bf16.mxu0 %v2379_v14  ;;  %v2239_v28 = vpack.c.bf16 %v778_v26, %v774_v25  ;;  %v1101_v32 = vld [vmem:[#allocation7 + $0x188] sm:$0xff]  ;;  %v2393_v40 = vpack.c.bf16 %v1104_v37, %v1100_v36  ;;  %v1108_v42 = vld [vmem:[#allocation7 + $0x1c0] sm:$0xff] }
  0xa3   : > { %2234 = vmatpush1.bf16.msra.mxu1 %v2233_v50  ;;  %v1105_v33 = vld [vmem:[#allocation7 + $0x1a8] sm:$0xff]  ;;  %v1112_v43 = vld [vmem:[#allocation7 + $0x1e0] sm:$0xff] }
  0xa4   : > { %2236 = vmatprep.subr.bf16.mxu1 %v2235_v53  ;;  %v2391_v35 = vpack.c.bf16 %v1105_v33, %v1101_v32  ;;  %v1109_v38 = vld [vmem:[#allocation7 + $0x1c8] sm:$0xff]  ;;  %v2397_v46 = vpack.c.bf16 %v1112_v43, %v1108_v42  ;;  %v1116_v48 = vld [vmem:[#allocation7 + $0x200] sm:$0xff] }
  0xa5   : > { %2382 = vmatpush1.bf16.msra.mxu0 %v2381_v19  ;;  %v1113_v39 = vld [vmem:[#allocation7 + $0x1e8] sm:$0xff]  ;;  %v1120_v49 = vld [vmem:[#allocation7 + $0x220] sm:$0xff] }
  0xa6   : > { %2384 = vmatprep.subr.bf16.mxu0 %v2383_v20  ;;  %v2395_v41 = vpack.c.bf16 %v1113_v39, %v1109_v38  ;;  %v1117_v44 = vld [vmem:[#allocation7 + $0x208] sm:$0xff]  ;;  %v2401_v52 = vpack.c.bf16 %v1120_v49, %v1116_v48  ;;  %v1124_v54 = vld [vmem:[#allocation7 + $0x240] sm:$0xff] }
  0xa7   : > { %2238 = vmatpush1.bf16.msra.mxu1 %v2237_v56  ;;  %v1121_v45 = vld [vmem:[#allocation7 + $0x228] sm:$0xff]  ;;  %v1128_v55 = vld [vmem:[#allocation7 + $0x260] sm:$0xff] }
  0xa8   : > { %2240 = vmatprep.subr.bf16.mxu1 %v2239_v28  ;;  %v2399_v47 = vpack.c.bf16 %v1121_v45, %v1117_v44  ;;  %v1125_v50 = vld [vmem:[#allocation7 + $0x248] sm:$0xff]  ;;  %v2405_v59 = vpack.c.bf16 %v1128_v55, %v1124_v54  ;;  %v1132_v61 = vld [vmem:[#allocation7 + $0x280] sm:$0xff] }
  0xa9   : > { %2386 = vmatpush1.bf16.msra.mxu0 %v2385_v27  ;;  %v1129_v51 = vld [vmem:[#allocation7 + $0x268] sm:$0xff]  ;;  %v1136_v62 = vld [vmem:[#allocation7 + $0x2a0] sm:$0xff] }
  0xaa   : > { %2388 = vmatprep.subr.bf16.mxu0 %v2387_v29  ;;  %v2403_v53 = vpack.c.bf16 %v1129_v51, %v1125_v50  ;;  %v1133_v56 = vld [vmem:[#allocation7 + $0x288] sm:$0xff]  ;;  %v2409_v1 = vpack.c.bf16 %v1136_v62, %v1132_v61  ;;  %v1140_v3 = vld [vmem:[#allocation7 + $0x2c0] sm:$0xff] }
  0xab   : > { %v1137_v58 = vld [vmem:[#allocation7 + $0x2a8] sm:$0xff]  ;;  %v1144_v4 = vld [vmem:[#allocation7 + $0x2e0] sm:$0xff] }
  0xac   : > { %v2407_v60 = vpack.c.bf16 %v1137_v58, %v1133_v56  ;;  %v1141_v63 = vld [vmem:[#allocation7 + $0x2c8] sm:$0xff]  ;;  %v2413_v7 = vpack.c.bf16 %v1144_v4, %v1140_v3  ;;  %v1148_v9 = vld [vmem:[#allocation7 + $0x300] sm:$0xff] }
  0xad   : > { %2390 = vmatpush1.bf16.msra.mxu0 %v2389_v34  ;;  %v1145_v0 = vld [vmem:[#allocation7 + $0x2e8] sm:$0xff]  ;;  %v1152_v10 = vld [vmem:[#allocation7 + $0x320] sm:$0xff] }
  0xae   : > { %2392 = vmatprep.subr.bf16.mxu0 %v2391_v35  ;;  %v2411_v2 = vpack.c.bf16 %v1145_v0, %v1141_v63  ;;  %v1149_v5 = vld [vmem:[#allocation7 + $0x308] sm:$0xff]  ;;  %v2417_v13 = vpack.c.bf16 %v1152_v10, %v1148_v9  ;;  %v1156_v15 = vld [vmem:[#allocation7 + $0x340] sm:$0xff] }
  0xaf   : > { %v1153_v6 = vld [vmem:[#allocation7 + $0x328] sm:$0xff]  ;;  %v1160_v16 = vld [vmem:[#allocation7 + $0x360] sm:$0xff] }
  0xb0   : > { %v2415_v8 = vpack.c.bf16 %v1153_v6, %v1149_v5  ;;  %v1157_v11 = vld [vmem:[#allocation7 + $0x348] sm:$0xff]  ;;  %v2421_v19 = vpack.c.bf16 %v1160_v16, %v1156_v15  ;;  %v1164_v21 = vld [vmem:[#allocation7 + $0x380] sm:$0xff] }
  0xb1   : > { %2394 = vmatpush1.bf16.msra.mxu0 %v2393_v40  ;;  %v1161_v12 = vld [vmem:[#allocation7 + $0x368] sm:$0xff]  ;;  %v1168_v22 = vld [vmem:[#allocation7 + $0x3a0] sm:$0xff] }
  0xb2   : > { %2396 = vmatprep.subr.bf16.mxu0 %v2395_v41  ;;  %v2419_v14 = vpack.c.bf16 %v1161_v12, %v1157_v11  ;;  %v1165_v17 = vld [vmem:[#allocation7 + $0x388] sm:$0xff]  ;;  %v2425_v23 = vpack.c.bf16 %v1168_v22, %v1164_v21  ;;  %v3205_v24 = vld [vmem:[%s3466_s2] ss:$0 sm:$0xff] }
  0xb3   : > { %v1169_v18 = vld [vmem:[#allocation7 + $0x3a8] sm:$0xff]  ;;  %v773_v26 = vld [vmem:[#allocation5] sm:$0xff] }
  0xb4   : > { %v2423_v20 = vpack.c.bf16 %v1169_v18, %v1165_v17  ;;  %v777_v27 = vld [vmem:[#allocation5 + $0x20] sm:$0xff]  ;;  %v782_v29 = vld [vmem:[#allocation5 + $0x48] sm:$0xff] }
  0xb5   : > { %2398 = vmatpush1.bf16.msra.mxu0 %v2397_v46  ;;  %v786_v30 = vld [vmem:[#allocation5 + $0x68] sm:$0xff]  ;;  %v2241_v32 = vpack.c.bf16 %v777_v27, %v773_v26  ;;  %v781_v37 = vld [vmem:[#allocation5 + $0x40] sm:$0xff] }
  0xb6   : > { %2400 = vmatprep.subr.bf16.mxu0 %v2399_v47  ;;  %v2243_v36 = vpack.c.bf16 %v786_v30, %v782_v29  ;;  %v785_v38 = vld [vmem:[#allocation5 + $0x60] sm:$0xff]  ;;  %v790_v40 = vld [vmem:[#allocation5 + $0x88] sm:$0xff] }
  0xb7   : > { %v794_v41 = vld [vmem:[#allocation5 + $0xa8] sm:$0xff]  ;;  %v2245_v43 = vpack.c.bf16 %v785_v38, %v781_v37  ;;  %v789_v47 = vld [vmem:[#allocation5 + $0x80] sm:$0xff] }
  0xb8   : > { %v2247_v46 = vpack.c.bf16 %v794_v41, %v790_v40  ;;  %v793_v48 = vld [vmem:[#allocation5 + $0xa0] sm:$0xff]  ;;  %v798_v50 = vld [vmem:[#allocation5 + $0xc8] sm:$0xff] }
  0xb9   : > { %2402 = vmatpush1.bf16.msra.mxu0 %v2401_v52  ;;  %v802_v51 = vld [vmem:[#allocation5 + $0xe8] sm:$0xff]  ;;  %v797_v58 = vld [vmem:[#allocation5 + $0xc0] sm:$0xff] }
  0xba   : > { %2404 = vmatprep.subr.bf16.mxu0 %v2403_v53  ;;  %v2249_v53 = vpack.c.bf16 %v793_v48, %v789_v47  ;;  %v2251_v56 = vpack.c.bf16 %v802_v51, %v798_v50  ;;  %v806_v61 = vld [vmem:[#allocation5 + $0x108] sm:$0xff]  ;;  %v805_v10 = vld [vmem:[#allocation5 + $0x100] sm:$0xff] }
  0xbb   : > { %v810_v62 = vld [vmem:[#allocation5 + $0x128] sm:$0xff]  ;;  %v809_v11 = vld [vmem:[#allocation5 + $0x120] sm:$0xff] }
  0xbc   : > { %v2257_v12 = vpack.c.bf16 %v809_v11, %v805_v10  ;;  %v1172_v16 = vld [vmem:[#allocation7 + $0x3c0] sm:$0xff]  ;;  %v830_v30 = vld [vmem:[#allocation5 + $0x1c8] sm:$0xff] }
  0xbd   : > { %2406 = vmatpush1.bf16.msra.mxu0 %v2405_v59  ;;  %v801_v59 = vld [vmem:[#allocation5 + $0xe0] sm:$0xff]  ;;  %v842_v37 = vld [vmem:[#allocation5 + $0x228] sm:$0xff] }
  0xbe   : > { %2408 = vmatprep.subr.bf16.mxu0 %v2407_v60  ;;  %v2253_v0 = vpack.c.bf16 %v801_v59, %v797_v58  ;;  %v1176_v17 = vld [vmem:[#allocation7 + $0x3e0] sm:$0xff]  ;;  %v854_v48 = vld [vmem:[#allocation5 + $0x288] sm:$0xff] }
  0xbf   : > { %v2429_v18 = vpack.c.bf16 %v1176_v17, %v1172_v16  ;;  %v813_v22 = vld [vmem:[#allocation5 + $0x140] sm:$0xff]  ;;  %v890_v10 = vld [vmem:[#allocation5 + $0x3a8] sm:$0xff] }
  0xc0   : > { %v821_v27 = vld [vmem:[#allocation5 + $0x180] sm:$0xff]  ;;  %v898_v16 = vld [vmem:[#allocation5 + $0x3e8] sm:$0xff] }
  0xc1   : > { %2410 = vmatpush1.bf16.msra.mxu0 %v2409_v1  ;;  %v841_v40 = vld [vmem:[#allocation5 + $0x220] sm:$0xff] }
  0xc2   : > { %2412 = vmatprep.subr.bf16.mxu0 %v2411_v2  ;;  %v2255_v2 = vpack.c.bf16 %v810_v62, %v806_v61  ;;  %v853_v51 = vld [vmem:[#allocation5 + $0x280] sm:$0xff]  ;;  %v870_v61 = vld [vmem:[#allocation5 + $0x308] sm:$0xff] }
  0xc3   : > { %v861_v58 = vld [vmem:[#allocation5 + $0x2c0] sm:$0xff]  ;;  %v874_v62 = vld [vmem:[#allocation5 + $0x328] sm:$0xff] }
  0xc4   : > { %v865_v59 = vld [vmem:[#allocation5 + $0x2e0] sm:$0xff] }
  0xc5   : > { %2414 = vmatpush1.bf16.msra.mxu0 %v2413_v7 }
  0xc6   : > { %2416 = vmatprep.subr.bf16.mxu0 %v2415_v8 }
  0xc9   : > { %2418 = vmatpush1.bf16.msra.mxu0 %v2417_v13  ;;  %v1173_v13 = vld [vmem:[#allocation7 + $0x3c8] sm:$0xff] }
  0xca   : > { %2420 = vmatprep.subr.bf16.mxu0 %v2419_v14  ;;  %v1177_v14 = vld [vmem:[#allocation7 + $0x3e8] sm:$0xff] }
  0xcb   : > { %v2427_v15 = vpack.c.bf16 %v1177_v14, %v1173_v13  ;;  %v889_v13 = vld [vmem:[#allocation5 + $0x3a0] sm:$0xff] }
  0xcd   : > { %2422 = vmatpush1.bf16.msra.mxu0 %v2421_v19  ;;  %v814_v19 = vld [vmem:[#allocation5 + $0x148] sm:$0xff] }
  0xce   : > { %2424 = vmatprep.subr.bf16.mxu0 %v2423_v20  ;;  %v818_v20 = vld [vmem:[#allocation5 + $0x168] sm:$0xff] }
  0xcf   : > { %v2259_v21 = vpack.c.bf16 %v818_v20, %v814_v19  ;;  %v897_v19 = vld [vmem:[#allocation5 + $0x3e0] sm:$0xff] }
  0xd1   : > { %2426 = vmatpush1.bf16.msra.mxu0 %v2425_v23  ;;  %v817_v23 = vld [vmem:[#allocation5 + $0x160] sm:$0xff] }
  0xd2   : > { %2428 = vmatprep.subr.bf16.mxu0 %v2427_v15  ;;  %v894_v15 = vld [vmem:[#allocation5 + $0x3c8] sm:$0xff] }
  0xd3   : > { %v2299_v17 = vpack.c.bf16 %v898_v16, %v894_v15 }
  0xd5   : > { %2430 = vmatpush1.bf16.msra.mxu0 %v2429_v18  ;;  %v893_v18 = vld [vmem:[#allocation5 + $0x3c0] sm:$0xff] }
  0xd6   : > { %v2301_v20 = vpack.c.bf16 %v897_v19, %v893_v18 }
 0x161   : > { %v2197_v25 = vpop.f32.mrb[0].mxu0 }
 0x162   : > { %v533_v28 = vpop.f32.mrb[1].mxu0  ;;  %v539_v33 = vadd.f32 %v2197_v25, %v3205_v24  ;;  %v826_v25 = vld [vmem:[#allocation5 + $0x1a8] sm:$0xff] }
 0x163   : > { %v534_v31 = vadd.f32 %v3205_v24, %v533_v28  ;;  %v825_v28 = vld [vmem:[#allocation5 + $0x1a0] sm:$0xff] }
 0x164   : > { %v573_v44 = vmax.f32 %v539_v33, 0.0  ;;  %v2265_v29 = vpack.c.bf16 %v825_v28, %v821_v27  ;;  %v829_v33 = vld [vmem:[#allocation5 + $0x1c0] sm:$0xff] }
 0x165   : > { %v572_v34 = vmax.f32 %v534_v31, 0.0  ;;  %v2200_v35 = vpop.f32.mrb[2].mxu0  ;;  %v834_v31 = vld [vmem:[#allocation5 + $0x1e8] sm:$0xff] }
 0x166   : > { %v543_v39 = vpop.f32.mrb[3].mxu0  ;;  %v549_v54 = vadd.f32 %v2200_v35, %v3205_v24 }
 0x167   : > { %689 = vmatmul.mubr.f32.vlgmr.msra.gmra.mrb[0].mxu1 %v572_v34  ;;  %v544_v42 = vadd.f32 %v3205_v24, %v543_v39  ;;  %v833_v34 = vld [vmem:[#allocation5 + $0x1e0] sm:$0xff] }
 0x168   : > { %694 = vmatprep.mubr.f32.mxu1 %v2938_v57  ;;  %2242 = vmatpush1.bf16.msra.mxu1 %v2241_v32  ;;  %v575_v1 = vmax.f32 %v549_v54, 0.0  ;;  %v2267_v32 = vpack.c.bf16 %v834_v31, %v830_v30  ;;  %v2269_v35 = vpack.c.bf16 %v833_v34, %v829_v33  ;;  %v837_v39 = vld [vmem:[#allocation5 + $0x200] sm:$0xff]  ;;  %v862_v54 = vld [vmem:[#allocation5 + $0x2c8] sm:$0xff] }
 0x169   : > { %v2203_v45 = vpop.f32.mrb[4].mxu0  ;;  %2244 = vmatprep.subr.bf16.mxu1 %v2243_v36  ;;  %v574_v52 = vmax.f32 %v544_v42, 0.0  ;;  %v838_v36 = vld [vmem:[#allocation5 + $0x208] sm:$0xff]  ;;  %v2273_v41 = vpack.c.bf16 %v841_v40, %v837_v39 }
 0x16a   : > { %v553_v49 = vpop.f32.mrb[5].mxu0  ;;  %v559_v4 = vadd.f32 %v2203_v45, %v3205_v24  ;;  %v2271_v38 = vpack.c.bf16 %v842_v37, %v838_v36  ;;  %v846_v42 = vld [vmem:[#allocation5 + $0x248] sm:$0xff]  ;;  %v845_v45 = vld [vmem:[#allocation5 + $0x240] sm:$0xff] }
 0x16b   : > { %695 = vmatmul.mubr.f32.gmra.mrb[2].mxu1 %v573_v44  ;;  %v554_v63 = vadd.f32 %v3205_v24, %v553_v49  ;;  %v858_v49 = vld [vmem:[#allocation5 + $0x2a8] sm:$0xff] }
 0x16c   : > { %700 = vmatprep.mubr.f32.mxu1 %v2938_v57  ;;  %2246 = vmatpush1.bf16.msra.mxu1 %v2245_v43  ;;  %v577_v6 = vmax.f32 %v559_v4, 0.0  ;;  %v850_v43 = vld [vmem:[#allocation5 + $0x268] sm:$0xff]  ;;  %v2279_v50 = vpack.c.bf16 %v858_v49, %v854_v48 }
 0x16d   : > { %v2206_v55 = vpop.f32.mrb[6].mxu0  ;;  %2248 = vmatprep.subr.bf16.mxu1 %v2247_v46  ;;  %v576_v3 = vmax.f32 %v554_v63, 0.0  ;;  %v2275_v44 = vpack.c.bf16 %v850_v43, %v846_v42  ;;  %v849_v46 = vld [vmem:[#allocation5 + $0x260] sm:$0xff]  ;;  %v2287_v63 = vpack.c.bf16 %v874_v62, %v870_v61  ;;  %v882_v4 = vld [vmem:[#allocation5 + $0x368] sm:$0xff] }
 0x16e   : > { %v563_v60 = vpop.f32.mrb[7].mxu0  ;;  %v569_v8 = vadd.f32 %v2206_v55, %v3205_v24  ;;  %v2277_v47 = vpack.c.bf16 %v849_v46, %v845_v45  ;;  %v866_v55 = vld [vmem:[#allocation5 + $0x2e8] sm:$0xff] }
 0x16f   : > { %701 = vmatmul.mubr.f32.gmra.mrb[4].mxu1 %v574_v52  ;;  %v564_v5 = vadd.f32 %v3205_v24, %v563_v60  ;;  %v822_v24 = vld [vmem:[#allocation5 + $0x188] sm:$0xff]  ;;  %v857_v52 = vld [vmem:[#allocation5 + $0x2a0] sm:$0xff]  ;;  %v2285_v60 = vpack.c.bf16 %v865_v59, %v861_v58 }
 0x170   : > { %706 = vmatprep.mubr.f32.mxu1 %v2938_v57  ;;  %2250 = vmatpush1.bf16.msra.mxu1 %v2249_v53  ;;  %v579_v9 = vmax.f32 %v569_v8, 0.0  ;;  %v2263_v26 = vpack.c.bf16 %v826_v25, %v822_v24  ;;  %v2281_v53 = vpack.c.bf16 %v857_v52, %v853_v51 }
 0x171   : > { %2252 = vmatprep.subr.bf16.mxu1 %v2251_v56  ;;  %v578_v7 = vmax.f32 %v564_v5, 0.0  ;;  %v2283_v56 = vpack.c.bf16 %v866_v55, %v862_v54 }
 0x173   : > { %707 = vmatmul.mubr.f32.gmra.mrb[6].mxu1 %v575_v1  ;;  %v873_v1 = vld [vmem:[#allocation5 + $0x320] sm:$0xff] }
 0x174   : > { %712 = vmatprep.mubr.f32.mxu1 %v2938_v57  ;;  %2254 = vmatpush1.bf16.msra.mxu1 %v2253_v0  ;;  %v869_v0 = vld [vmem:[#allocation5 + $0x300] sm:$0xff] }
 0x175   : > { %2256 = vmatprep.subr.bf16.mxu1 %v2255_v2  ;;  %v2289_v2 = vpack.c.bf16 %v873_v1, %v869_v0 }
 0x177   : > { %713 = vmatmul.mubr.f32.gmra.mrb[8].mxu1 %v576_v3  ;;  %v878_v3 = vld [vmem:[#allocation5 + $0x348] sm:$0xff] }
 0x178   : > { %718 = vmatprep.mubr.f32.mxu1 %v2938_v57  ;;  %2258 = vmatpush1.bf16.msra.mxu1 %v2257_v12  ;;  %v2291_v5 = vpack.c.bf16 %v882_v4, %v878_v3  ;;  %v885_v12 = vld [vmem:[#allocation5 + $0x380] sm:$0xff] }
 0x179   : > { %2260 = vmatprep.subr.bf16.mxu1 %v2259_v21  ;;  %v2297_v14 = vpack.c.bf16 %v889_v13, %v885_v12  ;;  %v776_v21 = vld [vmem:[#allocation5 + $0x18] sm:$0xff] }
 0x17b   : > { %719 = vmatmul.mubr.f32.gmra.mrb[10].mxu1 %v577_v6  ;;  %v877_v6 = vld [vmem:[#allocation5 + $0x340] sm:$0xff] }
 0x17c   : > { %724 = vmatprep.mubr.f32.mxu1 %v2938_v57 }
 0x17f   : > { %725 = vmatmul.mubr.f32.gmra.mrb[12].mxu1 %v578_v7  ;;  %v881_v7 = vld [vmem:[#allocation5 + $0x360] sm:$0xff] }
 0x180   : > { %730 = vmatprep.mubr.f32.mxu1 %v2938_v57  ;;  %v2261_v57 = vpack.c.bf16 %v817_v23, %v813_v22  ;;  %v2293_v8 = vpack.c.bf16 %v881_v7, %v877_v6  ;;  %v780_v22 = vld [vmem:[#allocation5 + $0x38] sm:$0xff] }
 0x181   : > { %v2303_v23 = vpack.c.bf16 %v780_v22, %v776_v21 }
 0x182   : > { %2262 = vmatpush1.bf16.msra.mxu1 %v2261_v57  ;;  %v614_v57 = vlaneseq }
 0x183   : > { %731 = vmatmul.mubr.f32.gmra.mrb[14].mxu1 %v579_v9  ;;  %2264 = vmatprep.subr.bf16.mxu1 %v2263_v26  ;;  %v886_v9 = vld [vmem:[#allocation5 + $0x388] sm:$0xff]  ;;  %v612_v26 = vld [vmem:[%s3468_s4] sm:$0x3] }
 0x184   : > { %v2295_v11 = vpack.c.bf16 %v890_v10, %v886_v9  ;;  %v3222_v24 = vshrl.u32 %v614_v57, 7 }
 0x186   : > { %2266 = vmatpush1.bf16.msra.mxu1 %v2265_v29  ;;  %v3225_v25 = vsub.s32 1, %v3222_v24  ;;  %v3231_v27 = vsub.s32 0, %v3222_v24 }
 0x187   : > { %2268 = vmatprep.subr.bf16.mxu1 %v2267_v32 }
 0x188   : > { %v621_v28 = vrot.slane %v612_v26, %v3225_v25  ;;  %v617_v29 = vrot.slane %v612_v26, %v3231_v27 }
 0x18a   : > { %2270 = vmatpush1.bf16.msra.mxu1 %v2269_v35 }
 0x18b   : > { %2272 = vmatprep.subr.bf16.mxu1 %v2271_v38 }
 0x18e   : > { %2274 = vmatpush1.bf16.msra.mxu1 %v2273_v41 }
 0x18f   : > { %2276 = vmatprep.subr.bf16.mxu1 %v2275_v44 }
 0x192   : > { %2278 = vmatpush1.bf16.msra.mxu1 %v2277_v47 }
 0x193   : > { %2280 = vmatprep.subr.bf16.mxu1 %v2279_v50 }
 0x196   : > { %2282 = vmatpush1.bf16.msra.mxu1 %v2281_v53 }
 0x197   : > { %2284 = vmatprep.subr.bf16.mxu1 %v2283_v56 }
 0x19a   : > { %2286 = vmatpush1.bf16.msra.mxu1 %v2285_v60 }
 0x19b   : > { %2288 = vmatprep.subr.bf16.mxu1 %v2287_v63 }
 0x19e   : > { %2290 = vmatpush1.bf16.msra.mxu1 %v2289_v2 }
 0x19f   : > { %2292 = vmatprep.subr.bf16.mxu1 %v2291_v5 }
 0x1a2   : > { %2294 = vmatpush1.bf16.msra.mxu1 %v2293_v8 }
 0x1a3   : > { %2296 = vmatprep.subr.bf16.mxu1 %v2295_v11 }
 0x1a6   : > { %2298 = vmatpush1.bf16.msra.mxu1 %v2297_v14 }
 0x1a7   : > { %2300 = vmatprep.subr.bf16.mxu1 %v2299_v17 }
 0x1aa   : > { %2302 = vmatpush1.bf16.msra.mxu1 %v2301_v20 }
 0x1ab   : > { %2304 = vmatprep.subr.bf16.mxu1 %v2303_v23 }
 0x23a   : > { %v690_v30 = vpop.f32.mrb[0].mxu1 }
 0x23b   : > { %v692_v31 = vpop.f32.mrb[1].mxu1  ;;  %v3237_v33 = vadd.f32 %v690_v30, %v617_v29 }
 0x23c   : > { %v3235_v32 = vadd.f32 %v692_v31, %v621_v28 }
 0x23e   : > { %v696_v34 = vpop.f32.mrb[2].mxu1  ;;  %1244 = vmatprep.mubr.f32.mxu0 %v3235_v32 }
 0x23f   : > { %v698_v35 = vpop.f32.mrb[3].mxu1  ;;  %1245 = vmatmul.mubr.f32.vlgmr.msra.gmra.mrb[8].mxu0 %v3237_v33  ;;  %v3243_v37 = vadd.f32 %v696_v34, %v617_v29 }
 0x240   : > { %v3241_v36 = vadd.f32 %v698_v35, %v621_v28  ;;  %v775_v35 = vld [vmem:[#allocation5 + $0x10] sm:$0xff] }
 0x241   : > { %v737_v48 = vmax.f32 %v3237_v33, %v3243_v37 }
 0x242   : > { %v702_v38 = vpop.f32.mrb[4].mxu1  ;;  %1250 = vmatprep.mubr.f32.mxu0 %v3241_v36  ;;  %v746_v46 = vmax.f32 %v3235_v32, %v3241_v36 }
 0x243   : > { %v704_v39 = vpop.f32.mrb[5].mxu1  ;;  %1251 = vmatmul.mubr.f32.gmra.mrb[10].mxu0 %v3243_v37  ;;  %v3249_v41 = vadd.f32 %v702_v38, %v617_v29  ;;  %v779_v38 = vld [vmem:[#allocation5 + $0x30] sm:$0xff] }
 0x244   : > { %v3247_v40 = vadd.f32 %v704_v39, %v621_v28 }
 0x245   : > { %v738_v52 = vmax.f32 %v737_v48, %v3249_v41 }
 0x246   : > { %v708_v42 = vpop.f32.mrb[6].mxu1  ;;  %1256 = vmatprep.mubr.f32.mxu0 %v3247_v40  ;;  %v747_v50 = vmax.f32 %v746_v46, %v3247_v40 }
 0x247   : > { %v710_v43 = vpop.f32.mrb[7].mxu1  ;;  %1257 = vmatmul.mubr.f32.gmra.mrb[12].mxu0 %v3249_v41  ;;  %v3255_v45 = vadd.f32 %v708_v42, %v617_v29  ;;  %v784_v42 = vld [vmem:[#allocation5 + $0x58] sm:$0xff] }
 0x248   : > { %v3253_v44 = vadd.f32 %v710_v43, %v621_v28  ;;  %v788_v43 = vld [vmem:[#allocation5 + $0x78] sm:$0xff] }
 0x249   : > { %v739_v56 = vmax.f32 %v738_v52, %v3255_v45  ;;  %v2307_v52 = vpack.c.bf16 %v788_v43, %v784_v42  ;;  %v831_v42 = vld [vmem:[#allocation5 + $0x1d0] sm:$0xff] }
 0x24a   : > { %v714_v47 = vpop.f32.mrb[8].mxu1  ;;  %1262 = vmatprep.mubr.f32.mxu0 %v3253_v44  ;;  %v748_v54 = vmax.f32 %v747_v50, %v3253_v44  ;;  %v835_v43 = vld [vmem:[#allocation5 + $0x1f0] sm:$0xff] }
 0x24b   : > { %v716_v49 = vpop.f32.mrb[9].mxu1  ;;  %1263 = vmatmul.mubr.f32.gmra.mrb[14].mxu0 %v3255_v45  ;;  %v3267_v53 = vadd.f32 %v714_v47, %v617_v29  ;;  %v740_v63 = vrot.slane %v739_v56, 4 }
 0x24c   : > { %v3264_v51 = vadd.f32 %v716_v49, %v621_v28  ;;  %v749_v61 = vrot.slane %v748_v54, 4  ;;  %v2305_v49 = vpack.c.bf16 %v779_v38, %v775_v35  ;;  %v836_v35 = vld [vmem:[#allocation5 + $0x1f8] sm:$0xff] }
 0x24d   : > { %v741_v7 = vmax.f32 %v739_v56, %v740_v63 }
 0x24e   : > { %v720_v55 = vpop.f32.mrb[10].mxu1  ;;  %1268 = vmatprep.mubr.f32.mxu0 %v3264_v51  ;;  %v750_v4 = vmax.f32 %v748_v54, %v749_v61  ;;  %v783_v54 = vld [vmem:[#allocation5 + $0x50] sm:$0xff]  ;;  %v796_v61 = vld [vmem:[#allocation5 + $0xb8] sm:$0xff] }
 0x24f   : > { %v722_v58 = vpop.f32.mrb[11].mxu1  ;;  %1269 = vmatmul.mubr.f32.gmra.mrb[16].mxu0 %v3267_v53  ;;  %v3275_v60 = vadd.f32 %v720_v55, %v617_v29  ;;  %v742_v16 = vrot.slane %v741_v7, 2  ;;  %v787_v55 = vld [vmem:[#allocation5 + $0x70] sm:$0xff] }
 0x250   : > { %v3273_v59 = vadd.f32 %v722_v58, %v621_v28  ;;  %v751_v14 = vrot.slane %v750_v4, 2  ;;  %v792_v58 = vld [vmem:[#allocation5 + $0x98] sm:$0xff] }
 0x251   : > { %v755_v3 = vmax.f32 %v3267_v53, %v3275_v60  ;;  %v743_v22 = vmax.f32 %v741_v7, %v742_v16  ;;  %v2311_v63 = vpack.c.bf16 %v796_v61, %v792_v58  ;;  %v807_v16 = vld [vmem:[#allocation5 + $0x110] sm:$0xff] }
 0x252   : > { %v726_v62 = vpop.f32.mrb[12].mxu1  ;;  %1274 = vmatprep.mubr.f32.mxu0 %v3273_v59  ;;  %v764_v5 = vmax.f32 %v3264_v51, %v3273_v59  ;;  %v752_v21 = vmax.f32 %v750_v4, %v751_v14  ;;  %v800_v4 = vld [vmem:[#allocation5 + $0xd8] sm:$0xff] }
 0x253   : > { %v3278_v0 = vadd.f32 %v726_v62, %v617_v29  ;;  %v728_v1 = vpop.f32.mrb[13].mxu1  ;;  %1275 = vmatmul.mubr.f32.gmra.mrb[18].mxu0 %v3275_v60  ;;  %v744_v30 = vrot.slane %v743_v22, 1  ;;  %v2309_v62 = vpack.c.bf16 %v787_v55, %v783_v54  ;;  %v848_v54 = vld [vmem:[#allocation5 + $0x258] sm:$0xff] }
 0x254   : > { %v3281_v2 = vadd.f32 %v728_v1, %v621_v28  ;;  %v791_v1 = vld [vmem:[#allocation5 + $0x90] sm:$0xff]  ;;  %v852_v55 = vld [vmem:[#allocation5 + $0x278] sm:$0xff] }
 0x255   : > { %v756_v8 = vmax.f32 %v755_v3, %v3278_v0  ;;  %v745_v48 = vmax.f32 %v743_v22, %v744_v30  ;;  %v795_v3 = vld [vmem:[#allocation5 + $0xb0] sm:$0xff]  ;;  %v2339_v61 = vpack.c.bf16 %v852_v55, %v848_v54 }
 0x256   : > { %v732_v6 = vpop.f32.mrb[14].mxu1  ;;  %1280 = vmatprep.mubr.f32.mxu0 %v3281_v2  ;;  %v765_v11 = vmax.f32 %v764_v5, %v3281_v2  ;;  %v804_v5 = vld [vmem:[#allocation5 + $0xf8] sm:$0xff]  ;;  %v815_v22 = vld [vmem:[#allocation5 + $0x150] sm:$0xff] }
 0x257   : > { %v3289_v9 = vadd.f32 %v732_v6, %v617_v29  ;;  %v734_v10 = vpop.f32.mrb[15].mxu1  ;;  %1281 = vmatmul.mubr.f32.gmra.mrb[20].mxu0 %v3278_v0  ;;  %v2313_v6 = vpack.c.bf16 %v795_v3, %v791_v1  ;;  %v2315_v7 = vpack.c.bf16 %v804_v5, %v800_v4  ;;  %v823_v30 = vld [vmem:[#allocation5 + $0x190] sm:$0xff]  ;;  %v856_v1 = vld [vmem:[#allocation5 + $0x298] sm:$0xff] }
 0x258   : > { %v3293_v12 = vadd.f32 %v734_v10, %v621_v28  ;;  %v753_v28 = vrot.slane %v752_v21, 1  ;;  %v803_v10 = vld [vmem:[#allocation5 + $0xf0] sm:$0xff]  ;;  %v860_v3 = vld [vmem:[#allocation5 + $0x2b8] sm:$0xff] }
 0x259   : > { %v757_v13 = vmax.f32 %v756_v8, %v3289_v9  ;;  %v799_v8 = vld [vmem:[#allocation5 + $0xd0] sm:$0xff]  ;;  %v2343_v5 = vpack.c.bf16 %v860_v3, %v856_v1 }
 0x25a   : > { %v766_v15 = vmax.f32 %v765_v11, %v3293_v12  ;;  %1286 = vmatprep.mubr.f32.mxu0 %v3293_v12  ;;  %v754_v46 = vmax.f32 %v752_v21, %v753_v28  ;;  %v808_v11 = vld [vmem:[#allocation5 + $0x118] sm:$0xff]  ;;  %v2317_v14 = vpack.c.bf16 %v803_v10, %v799_v8 }
 0x25b   : > { %v758_v17 = vrot.slane %v757_v13, 4  ;;  %1287 = vmatmul.mubr.f32.gmra.mrb[22].mxu0 %v3289_v9  ;;  %v864_v8 = vld [vmem:[#allocation5 + $0x2d8] sm:$0xff] }
 0x25c   : > { %v767_v18 = vrot.slane %v766_v15, 4  ;;  %v868_v10 = vld [vmem:[#allocation5 + $0x2f8] sm:$0xff] }
 0x25d   : > { %v759_v19 = vmax.f32 %v757_v13, %v758_v17  ;;  %v812_v13 = vld [vmem:[#allocation5 + $0x138] sm:$0xff]  ;;  %v811_v17 = vld [vmem:[#allocation5 + $0x130] sm:$0xff] }
 0x25e   : > { %v768_v20 = vmax.f32 %v766_v15, %v767_v18  ;;  %v2319_v15 = vpack.c.bf16 %v812_v13, %v808_v11  ;;  %v816_v18 = vld [vmem:[#allocation5 + $0x158] sm:$0xff]  ;;  %v2347_v13 = vpack.c.bf16 %v868_v10, %v864_v8 }
 0x25f   : > { %v760_v23 = vrot.slane %v759_v19, 2 }
 0x260   : > { %v769_v57 = vrot.slane %v768_v20, 2 }
 0x261   : > { %v761_v26 = vmax.f32 %v759_v19, %v760_v23  ;;  %v820_v19 = vld [vmem:[#allocation5 + $0x178] sm:$0xff]  ;;  %v819_v23 = vld [vmem:[#allocation5 + $0x170] sm:$0xff] }
 0x262   : > { %v770_v29 = vmax.f32 %v768_v20, %v769_v57  ;;  %v2321_v20 = vpack.c.bf16 %v811_v17, %v807_v16  ;;  %v2323_v21 = vpack.c.bf16 %v820_v19, %v816_v18  ;;  %v824_v57 = vld [vmem:[#allocation5 + $0x198] sm:$0xff]  ;;  %v2325_v28 = vpack.c.bf16 %v819_v23, %v815_v22 }
 0x263   : > { %v762_v31 = vrot.slane %v761_v26, 1  ;;  %v872_v16 = vld [vmem:[#allocation5 + $0x318] sm:$0xff] }
 0x264   : > { %v771_v34 = vrot.slane %v770_v29, 1  ;;  %v876_v17 = vld [vmem:[#allocation5 + $0x338] sm:$0xff] }
 0x265   : > { %v763_v39 = vmax.f32 %v761_v26, %v762_v31  ;;  %v828_v26 = vld [vmem:[#allocation5 + $0x1b8] sm:$0xff]  ;;  %v827_v31 = vld [vmem:[#allocation5 + $0x1b0] sm:$0xff]  ;;  %v2351_v19 = vpack.c.bf16 %v876_v17, %v872_v16 }
 0x266   : > { %v772_v47 = vmax.f32 %v770_v29, %v771_v34  ;;  %v2327_v29 = vpack.c.bf16 %v828_v26, %v824_v57  ;;  %v832_v34 = vld [vmem:[#allocation5 + $0x1d8] sm:$0xff]  ;;  %v2329_v38 = vpack.c.bf16 %v827_v31, %v823_v30 }
 0x267   : > { %v3301_v56 = vsel %vm905_vm2, %v763_v39, %v745_v48  ;;  %v2331_v39 = vpack.c.bf16 %v836_v35, %v832_v34  ;;  %v2333_v48 = vpack.c.bf16 %v835_v43, %v831_v42  ;;  %v880_v22 = vld [vmem:[#allocation5 + $0x358] sm:$0xff] }
 0x268   : > { %v907_v50 = vsel %vm905_vm2, %v772_v47, %v754_v46  ;;  %v840_v46 = vld [vmem:[#allocation5 + $0x218] sm:$0xff] }
 0x269   : > { %974 = vmatprep.mubr.f32.mxu1 %v907_v50  ;;  %v844_v47 = vld [vmem:[#allocation5 + $0x238] sm:$0xff] }
 0x26a   : > { %975 = vmatmul.mubr.f32.vlgmr.msra.gmra.mrb[16].mxu1 %v3301_v56  ;;  %v884_v23 = vld [vmem:[#allocation5 + $0x378] sm:$0xff] }
 0x26b   : > { %2306 = vmatpush1.bf16.msra.mxu1 %v2305_v49  ;;  %1045 = vmatprep.mubr.f32.mxu1 %v907_v50  ;;  %v2335_v49 = vpack.c.bf16 %v844_v47, %v840_v46  ;;  %v839_v50 = vld [vmem:[#allocation5 + $0x210] sm:$0xff]  ;;  %v2355_v26 = vpack.c.bf16 %v884_v23, %v880_v22  ;;  %v888_v30 = vld [vmem:[#allocation5 + $0x398] sm:$0xff] }
 0x26c   : > { %2308 = vmatprep.subr.bf16.mxu1 %v2307_v52  ;;  %v843_v52 = vld [vmem:[#allocation5 + $0x230] sm:$0xff]  ;;  %v892_v31 = vld [vmem:[#allocation5 + $0x3b8] sm:$0xff] }
 0x26d   : > { %v2337_v58 = vpack.c.bf16 %v843_v52, %v839_v50  ;;  %v2359_v35 = vpack.c.bf16 %v892_v31, %v888_v30  ;;  %v896_v42 = vld [vmem:[#allocation5 + $0x3d8] sm:$0xff]  ;;  %v1090_v23 = vld [vmem:[#allocation7 + $0x130] sm:$0xff] }
 0x26e   : > { %v900_v43 = vld [vmem:[#allocation5 + $0x3f8] sm:$0xff]  ;;  %v1094_v30 = vld [vmem:[#allocation7 + $0x150] sm:$0xff] }
 0x26f   : > { %2310 = vmatpush1.bf16.msra.mxu1 %v2309_v62  ;;  %v847_v62 = vld [vmem:[#allocation5 + $0x250] sm:$0xff]  ;;  %v2363_v47 = vpack.c.bf16 %v900_v43, %v896_v42  ;;  %v1055_v50 = vld [vmem:[#allocation7 + $0x18] sm:$0xff] }
 0x270   : > { %2312 = vmatprep.subr.bf16.mxu1 %v2311_v63  ;;  %v851_v63 = vld [vmem:[#allocation5 + $0x270] sm:$0xff]  ;;  %v1059_v52 = vld [vmem:[#allocation7 + $0x38] sm:$0xff] }
 0x271   : > { %v2341_v4 = vpack.c.bf16 %v851_v63, %v847_v62  ;;  %v2431_v55 = vpack.c.bf16 %v1059_v52, %v1055_v50  ;;  %v1063_v62 = vld [vmem:[#allocation7 + $0x58] sm:$0xff]  ;;  %v1098_v31 = vld [vmem:[#allocation7 + $0x170] sm:$0xff] }
 0x272   : > { %v1067_v63 = vld [vmem:[#allocation7 + $0x78] sm:$0xff]  ;;  %v1102_v42 = vld [vmem:[#allocation7 + $0x190] sm:$0xff] }
 0x273   : > { %2314 = vmatpush1.bf16.msra.mxu1 %v2313_v6  ;;  %v855_v6 = vld [vmem:[#allocation5 + $0x290] sm:$0xff]  ;;  %v2435_v3 = vpack.c.bf16 %v1067_v63, %v1063_v62  ;;  %v1600_v62 = vld [vmem:[#allocation8] sm:$0xff] }
 0x274   : > { %2316 = vmatprep.subr.bf16.mxu1 %v2315_v7  ;;  %v859_v7 = vld [vmem:[#allocation5 + $0x2b0] sm:$0xff] }
 0x275   : > { %v2345_v11 = vpack.c.bf16 %v859_v7, %v855_v6  ;;  %v1071_v6 = vld [vmem:[#allocation7 + $0x98] sm:$0xff]  ;;  %v1106_v43 = vld [vmem:[#allocation7 + $0x1b0] sm:$0xff] }
 0x276   : > { %v1075_v7 = vld [vmem:[#allocation7 + $0xb8] sm:$0xff]  ;;  %v1114_v52 = vld [vmem:[#allocation7 + $0x1f0] sm:$0xff] }
 0x277   : > { %2318 = vmatpush1.bf16.msra.mxu1 %v2317_v14  ;;  %v863_v14 = vld [vmem:[#allocation5 + $0x2d0] sm:$0xff]  ;;  %v2439_v10 = vpack.c.bf16 %v1075_v7, %v1071_v6 }
 0x278   : > { %2320 = vmatprep.subr.bf16.mxu1 %v2319_v15  ;;  %v867_v15 = vld [vmem:[#allocation5 + $0x2f0] sm:$0xff] }
 0x279   : > { %v2349_v18 = vpack.c.bf16 %v867_v15, %v863_v14  ;;  %v1079_v14 = vld [vmem:[#allocation7 + $0xd8] sm:$0xff] }
 0x27a   : > { %v1083_v15 = vld [vmem:[#allocation7 + $0xf8] sm:$0xff] }
 0x27b   : > { %2322 = vmatpush1.bf16.msra.mxu1 %v2321_v20  ;;  %v871_v20 = vld [vmem:[#allocation5 + $0x310] sm:$0xff]  ;;  %v2443_v17 = vpack.c.bf16 %v1083_v15, %v1079_v14 }
 0x27c   : > { %2324 = vmatprep.subr.bf16.mxu1 %v2323_v21  ;;  %v875_v21 = vld [vmem:[#allocation5 + $0x330] sm:$0xff] }
 0x27d   : > { %v2353_v57 = vpack.c.bf16 %v875_v21, %v871_v20  ;;  %v1087_v20 = vld [vmem:[#allocation7 + $0x118] sm:$0xff]  ;;  %v1118_v14 = vld [vmem:[#allocation7 + $0x210] sm:$0xff] }
 0x27e   : > { %v1091_v21 = vld [vmem:[#allocation7 + $0x138] sm:$0xff]  ;;  %v1122_v15 = vld [vmem:[#allocation7 + $0x230] sm:$0xff] }
 0x27f   : > { %2326 = vmatpush1.bf16.msra.mxu1 %v2325_v28  ;;  %v879_v28 = vld [vmem:[#allocation5 + $0x350] sm:$0xff]  ;;  %v2447_v22 = vpack.c.bf16 %v1091_v21, %v1087_v20  ;;  %v1608_v21 = vld [vmem:[#allocation8 + $0x40] sm:$0xff] }
 0x280   : > { %2328 = vmatprep.subr.bf16.mxu1 %v2327_v29  ;;  %v883_v29 = vld [vmem:[#allocation5 + $0x370] sm:$0xff] }
 0x281   : > { %v2357_v34 = vpack.c.bf16 %v883_v29, %v879_v28 }
 0x283   : > { %2330 = vmatpush1.bf16.msra.mxu1 %v2329_v38  ;;  %v887_v38 = vld [vmem:[#allocation5 + $0x390] sm:$0xff] }
 0x284   : > { %2332 = vmatprep.subr.bf16.mxu1 %v2331_v39  ;;  %v891_v39 = vld [vmem:[#allocation5 + $0x3b0] sm:$0xff] }
 0x285   : > { %v2361_v46 = vpack.c.bf16 %v891_v39, %v887_v38  ;;  %v2453_v38 = vpack.c.bf16 %v1098_v31, %v1094_v30  ;;  %v1139_v30 = vld [vmem:[#allocation7 + $0x2b8] sm:$0xff] }
 0x287   : > { %2334 = vmatpush1.bf16.msra.mxu1 %v2333_v48  ;;  %v895_v48 = vld [vmem:[#allocation5 + $0x3d0] sm:$0xff] }
 0x288   : > { %2336 = vmatprep.subr.bf16.mxu1 %v2335_v49  ;;  %v899_v49 = vld [vmem:[#allocation5 + $0x3f0] sm:$0xff] }
 0x289   : > { %v2365_v54 = vpack.c.bf16 %v899_v49, %v895_v48  ;;  %v2457_v48 = vpack.c.bf16 %v1106_v43, %v1102_v42  ;;  %v1110_v49 = vld [vmem:[#allocation7 + $0x1d0] sm:$0xff]  ;;  %v1617_v42 = vld [vmem:[#allocation8 + $0x88] sm:$0xff]  ;;  %v1619_v43 = vld [vmem:[#allocation8 + $0x98] sm:$0xff] }
 0x28b   : > { %2338 = vmatpush1.bf16.msra.mxu1 %v2337_v58  ;;  %v1054_v58 = vld [vmem:[#allocation7 + $0x10] sm:$0xff] }
 0x28c   : > { %2340 = vmatprep.subr.bf16.mxu1 %v2339_v61  ;;  %v1058_v61 = vld [vmem:[#allocation7 + $0x30] sm:$0xff] }
 0x28d   : > { %v2433_v1 = vpack.c.bf16 %v1058_v61, %v1054_v58  ;;  %v1601_v58 = vld [vmem:[#allocation8 + $0x8] sm:$0xff]  ;;  %v1603_v61 = vld [vmem:[#allocation8 + $0x18] sm:$0xff] }
 0x28e   : > { %v2495_v63 = vpack.c.bf16 %v1603_v61, %v1601_v58  ;;  %v1618_v58 = vld [vmem:[#allocation8 + $0x90] sm:$0xff] }
 0x28f   : > { %2342 = vmatpush1.bf16.msra.mxu1 %v2341_v4  ;;  %v1062_v4 = vld [vmem:[#allocation7 + $0x50] sm:$0xff] }
 0x290   : > { %2344 = vmatprep.subr.bf16.mxu1 %v2343_v5  ;;  %v1066_v5 = vld [vmem:[#allocation7 + $0x70] sm:$0xff]  ;;  %2496 = vmatprep.subr.bf16.mxu0 %v2495_v63  ;;  %v1623_v63 = vld [vmem:[#allocation8 + $0xb8] sm:$0xff] }
 0x291   : > { %v2437_v8 = vpack.c.bf16 %v1066_v5, %v1062_v4  ;;  %v1607_v4 = vld [vmem:[#allocation8 + $0x38] sm:$0xff]  ;;  %v2461_v5 = vpack.c.bf16 %v1114_v52, %v1110_v49 }
 0x292   : > { %v1143_v49 = vld [vmem:[#allocation7 + $0x2d8] sm:$0xff] }
 0x293   : > { %2346 = vmatpush1.bf16.msra.mxu1 %v2345_v11  ;;  %v1070_v11 = vld [vmem:[#allocation7 + $0x90] sm:$0xff] }
 0x294   : > { %2348 = vmatprep.subr.bf16.mxu1 %v2347_v13  ;;  %v1074_v13 = vld [vmem:[#allocation7 + $0xb0] sm:$0xff] }
 0x295   : > { %v2441_v16 = vpack.c.bf16 %v1074_v13, %v1070_v11  ;;  %v1609_v11 = vld [vmem:[#allocation8 + $0x48] sm:$0xff] }
 0x297   : > { %2350 = vmatpush1.bf16.msra.mxu1 %v2349_v18  ;;  %v1078_v18 = vld [vmem:[#allocation7 + $0xd0] sm:$0xff] }
 0x298   : > { %2352 = vmatprep.subr.bf16.mxu1 %v2351_v19  ;;  %v1082_v19 = vld [vmem:[#allocation7 + $0xf0] sm:$0xff] }
 0x29b   : > { %2354 = vmatpush1.bf16.msra.mxu1 %v2353_v57  ;;  %v1095_v57 = vld [vmem:[#allocation7 + $0x158] sm:$0xff] }
 0x29c   : > { %2356 = vmatprep.subr.bf16.mxu1 %v2355_v26  ;;  %v1099_v26 = vld [vmem:[#allocation7 + $0x178] sm:$0xff] }
 0x29d   : > { %v2451_v29 = vpack.c.bf16 %v1099_v26, %v1095_v57  ;;  %v1126_v26 = vld [vmem:[#allocation7 + $0x250] sm:$0xff] }
 0x29f   : > { %2358 = vmatpush1.bf16.msra.mxu1 %v2357_v34  ;;  %v1103_v34 = vld [vmem:[#allocation7 + $0x198] sm:$0xff] }
 0x2a0   : > { %2360 = vmatprep.subr.bf16.mxu1 %v2359_v35  ;;  %v1107_v35 = vld [vmem:[#allocation7 + $0x1b8] sm:$0xff] }
 0x2a1   : > { %v2455_v39 = vpack.c.bf16 %v1107_v35, %v1103_v34  ;;  %v1612_v35 = vld [vmem:[#allocation8 + $0x60] sm:$0xff] }
 0x2a3   : > { %2362 = vmatpush1.bf16.msra.mxu1 %v2361_v46  ;;  %v1111_v46 = vld [vmem:[#allocation7 + $0x1d8] sm:$0xff] }
 0x2a4   : > { %2364 = vmatprep.subr.bf16.mxu1 %v2363_v47  ;;  %v1115_v47 = vld [vmem:[#allocation7 + $0x1f8] sm:$0xff] }
 0x2a5   : > { %v2459_v50 = vpack.c.bf16 %v1115_v47, %v1111_v46  ;;  %v1134_v47 = vld [vmem:[#allocation7 + $0x290] sm:$0xff] }
 0x2a7   : > { %2366 = vmatpush1.bf16.msra.mxu1 %v2365_v54  ;;  %v1119_v54 = vld [vmem:[#allocation7 + $0x218] sm:$0xff] }
 0x2a8   : > { %2432 = vmatprep.subr.bf16.mxu1 %v2431_v55  ;;  %v1123_v55 = vld [vmem:[#allocation7 + $0x238] sm:$0xff] }
 0x2a9   : > { %v2463_v13 = vpack.c.bf16 %v1123_v55, %v1119_v54  ;;  %v2511_v54 = vpack.c.bf16 %v1619_v43, %v1617_v42  ;;  %v1616_v55 = vld [vmem:[#allocation8 + $0x80] sm:$0xff]  ;;  %v1630_v42 = vld [vmem:[#allocation8 + $0xf0] sm:$0xff] }
 0x2aa   : > { %1046 = vmatmul.mubr.f32.vlgmr.msra.gmra.mrb[18].mxu1 %v3301_v56  ;;  %v2445_v56 = vpack.c.bf16 %v1082_v19, %v1078_v18  ;;  %v1131_v18 = vld [vmem:[#allocation7 + $0x278] sm:$0xff] }
 0x2ab   : > { %2434 = vmatpush1.bf16.msra.mxu1 %v2433_v1  ;;  %1357 = vmatprep.mubr.f32.mxu1 %v3235_v32  ;;  %v1086_v32 = vld [vmem:[#allocation7 + $0x110] sm:$0xff] }
 0x2ac   : > { %2436 = vmatprep.subr.bf16.mxu1 %v2435_v3  ;;  %v2449_v28 = vpack.c.bf16 %v1090_v23, %v1086_v32  ;;  %v1602_v1 = vld [vmem:[#allocation8 + $0x10] sm:$0xff]  ;;  %v1605_v3 = vld [vmem:[#allocation8 + $0x28] sm:$0xff]  ;;  %v1615_v23 = vld [vmem:[#allocation8 + $0x78] sm:$0xff] }
 0x2ad   : > { %v2497_v6 = vpack.c.bf16 %v1602_v1, %v1600_v62  ;;  %v2499_v7 = vpack.c.bf16 %v1607_v4, %v1605_v3  ;;  %v1613_v32 = vld [vmem:[#allocation8 + $0x68] sm:$0xff]  ;;  %v1142_v3 = vld [vmem:[#allocation7 + $0x2d0] sm:$0xff] }
 0x2ae   : > { %v2507_v34 = vpack.c.bf16 %v1615_v23, %v1613_v32  ;;  %v1621_v62 = vld [vmem:[#allocation8 + $0xa8] sm:$0xff]  ;;  %v1146_v4 = vld [vmem:[#allocation7 + $0x2f0] sm:$0xff] }
 0x2af   : > { %2438 = vmatpush1.bf16.msra.mxu1 %v2437_v8  ;;  %v1604_v8 = vld [vmem:[#allocation8 + $0x20] sm:$0xff]  ;;  %2498 = vmatpush1.bf16.msra.mxu0 %v2497_v6  ;;  %v1155_v6 = vld [vmem:[#allocation7 + $0x338] sm:$0xff]  ;;  %v1626_v32 = vld [vmem:[#allocation8 + $0xd0] sm:$0xff] }
 0x2b0   : > { %2440 = vmatprep.subr.bf16.mxu1 %v2439_v10  ;;  %v1606_v10 = vld [vmem:[#allocation8 + $0x30] sm:$0xff]  ;;  %2500 = vmatprep.subr.bf16.mxu0 %v2499_v7  ;;  %v2513_v7 = vpack.c.bf16 %v1618_v58, %v1616_v55 }
 0x2b1   : > { %v2501_v19 = vpack.c.bf16 %v1606_v10, %v1604_v8  ;;  %v2515_v8 = vpack.c.bf16 %v1623_v63, %v1621_v62  ;;  %v1620_v10 = vld [vmem:[#allocation8 + $0xa0] sm:$0xff]  ;;  %v1634_v62 = vld [vmem:[#allocation8 + $0x110] sm:$0xff] }
 0x2b3   : > { %2442 = vmatpush1.bf16.msra.mxu1 %v2441_v16  ;;  %v1611_v16 = vld [vmem:[#allocation8 + $0x58] sm:$0xff]  ;;  %2502 = vmatpush1.bf16.msra.mxu0 %v2501_v19 }
 0x2b4   : > { %2444 = vmatprep.subr.bf16.mxu1 %v2443_v17  ;;  %v1127_v17 = vld [vmem:[#allocation7 + $0x258] sm:$0xff]  ;;  %v2503_v20 = vpack.c.bf16 %v1611_v16, %v1609_v11  ;;  %v1622_v11 = vld [vmem:[#allocation8 + $0xb0] sm:$0xff] }
 0x2b5   : > { %v2467_v57 = vpack.c.bf16 %v1131_v18, %v1127_v17  ;;  %v1150_v17 = vld [vmem:[#allocation7 + $0x310] sm:$0xff]  ;;  %v1159_v19 = vld [vmem:[#allocation7 + $0x358] sm:$0xff] }
 0x2b6   : > { %2504 = vmatprep.subr.bf16.mxu0 %v2503_v20  ;;  %v1154_v18 = vld [vmem:[#allocation7 + $0x330] sm:$0xff]  ;;  %v1163_v20 = vld [vmem:[#allocation7 + $0x378] sm:$0xff] }
 0x2b7   : > { %2446 = vmatpush1.bf16.msra.mxu1 %v2445_v56  ;;  %v1610_v56 = vld [vmem:[#allocation8 + $0x50] sm:$0xff]  ;;  %v2481_v23 = vpack.c.bf16 %v1154_v18, %v1150_v17  ;;  %v1640_v18 = vld [vmem:[#allocation8 + $0x140] sm:$0xff] }
 0x2b8   : > { %2448 = vmatprep.subr.bf16.mxu1 %v2447_v22  ;;  %v2465_v22 = vpack.c.bf16 %v1122_v15, %v1118_v14  ;;  %v2505_v31 = vpack.c.bf16 %v1610_v56, %v1608_v21  ;;  %v1625_v14 = vld [vmem:[#allocation8 + $0xc8] sm:$0xff]  ;;  %v1627_v15 = vld [vmem:[#allocation8 + $0xd8] sm:$0xff]  ;;  %v2517_v21 = vpack.c.bf16 %v1622_v11, %v1620_v10  ;;  %v1636_v10 = vld [vmem:[#allocation8 + $0x120] sm:$0xff] }
 0x2b9   : > { %v2519_v56 = vpack.c.bf16 %v1627_v15, %v1625_v14  ;;  %v1638_v11 = vld [vmem:[#allocation8 + $0x130] sm:$0xff]  ;;  %v1641_v14 = vld [vmem:[#allocation8 + $0x148] sm:$0xff]  ;;  %v1643_v15 = vld [vmem:[#allocation8 + $0x158] sm:$0xff] }
 0x2ba   : > { %2506 = vmatpush1.bf16.msra.mxu0 %v2505_v31  ;;  %v1167_v31 = vld [vmem:[#allocation7 + $0x398] sm:$0xff]  ;;  %v2535_v17 = vpack.c.bf16 %v1643_v15, %v1641_v14 }
 0x2bb   : > { %2450 = vmatpush1.bf16.msra.mxu1 %v2449_v28  ;;  %v1130_v28 = vld [vmem:[#allocation7 + $0x270] sm:$0xff]  ;;  %2508 = vmatprep.subr.bf16.mxu0 %v2507_v34  ;;  %v1171_v34 = vld [vmem:[#allocation7 + $0x3b8] sm:$0xff] }
 0x2bc   : > { %2452 = vmatprep.subr.bf16.mxu1 %v2451_v29  ;;  %v1135_v29 = vld [vmem:[#allocation7 + $0x298] sm:$0xff] }
 0x2bd   : > { %v2471_v46 = vpack.c.bf16 %v1139_v30, %v1135_v29  ;;  %v1158_v29 = vld [vmem:[#allocation7 + $0x350] sm:$0xff] }
 0x2be   : > { %v1162_v30 = vld [vmem:[#allocation7 + $0x370] sm:$0xff] }
 0x2bf   : > { %2454 = vmatpush1.bf16.msra.mxu1 %v2453_v38  ;;  %v1614_v38 = vld [vmem:[#allocation8 + $0x70] sm:$0xff]  ;;  %v2485_v43 = vpack.c.bf16 %v1162_v30, %v1158_v29  ;;  %v1659_v30 = vld [vmem:[#allocation8 + $0x1d8] sm:$0xff] }
 0x2c0   : > { %2456 = vmatprep.subr.bf16.mxu1 %v2455_v39  ;;  %v2469_v39 = vpack.c.bf16 %v1130_v28, %v1126_v26  ;;  %v2509_v52 = vpack.c.bf16 %v1614_v38, %v1612_v35  ;;  %v1631_v26 = vld [vmem:[#allocation8 + $0xf8] sm:$0xff]  ;;  %v2483_v28 = vpack.c.bf16 %v1163_v20, %v1159_v19  ;;  %v1642_v19 = vld [vmem:[#allocation8 + $0x150] sm:$0xff]  ;;  %v1645_v20 = vld [vmem:[#allocation8 + $0x168] sm:$0xff] }
 0x2c1   : > { %v1654_v29 = vld [vmem:[#allocation8 + $0x1b0] sm:$0xff] }
 0x2c2   : > { %2510 = vmatpush1.bf16.msra.mxu0 %v2509_v52  ;;  %v1175_v52 = vld [vmem:[#allocation7 + $0x3d8] sm:$0xff] }
 0x2c3   : > { %2458 = vmatpush1.bf16.msra.mxu1 %v2457_v48  ;;  %v1138_v48 = vld [vmem:[#allocation7 + $0x2b0] sm:$0xff]  ;;  %2512 = vmatprep.subr.bf16.mxu0 %v2511_v54  ;;  %v1179_v54 = vld [vmem:[#allocation7 + $0x3f8] sm:$0xff] }
 0x2c4   : > { %2460 = vmatprep.subr.bf16.mxu1 %v2459_v50  ;;  %v1147_v50 = vld [vmem:[#allocation7 + $0x2f8] sm:$0xff]  ;;  %v2473_v61 = vpack.c.bf16 %v1138_v48, %v1134_v47  ;;  %v2487_v48 = vpack.c.bf16 %v1171_v34, %v1167_v31  ;;  %v1656_v31 = vld [vmem:[#allocation8 + $0x1c0] sm:$0xff]  ;;  %v1658_v34 = vld [vmem:[#allocation8 + $0x1d0] sm:$0xff] }
 0x2c5   : > { %v2475_v1 = vpack.c.bf16 %v1147_v50, %v1143_v49  ;;  %v1635_v47 = vld [vmem:[#allocation8 + $0x118] sm:$0xff]  ;;  %v1166_v49 = vld [vmem:[#allocation7 + $0x390] sm:$0xff] }
 0x2c6   : > { %2514 = vmatpush1.bf16.msra.mxu0 %v2513_v7  ;;  %v1170_v50 = vld [vmem:[#allocation7 + $0x3b0] sm:$0xff] }
 0x2c7   : > { %2462 = vmatpush1.bf16.msra.mxu1 %v2461_v5  ;;  %v1151_v5 = vld [vmem:[#allocation7 + $0x318] sm:$0xff]  ;;  %2516 = vmatprep.subr.bf16.mxu0 %v2515_v8  ;;  %v2489_v63 = vpack.c.bf16 %v1170_v50, %v1166_v49 }
 0x2c8   : > { %2464 = vmatprep.subr.bf16.mxu1 %v2463_v13  ;;  %v2477_v13 = vpack.c.bf16 %v1146_v4, %v1142_v3  ;;  %v2479_v16 = vpack.c.bf16 %v1155_v6, %v1151_v5  ;;  %v1639_v3 = vld [vmem:[#allocation8 + $0x138] sm:$0xff]  ;;  %v2491_v4 = vpack.c.bf16 %v1179_v54, %v1175_v52  ;;  %v1174_v5 = vld [vmem:[#allocation7 + $0x3d0] sm:$0xff] }
 0x2c9   : > { %v1178_v6 = vld [vmem:[#allocation7 + $0x3f0] sm:$0xff] }
 0x2ca   : > { %2518 = vmatpush1.bf16.msra.mxu0 %v2517_v21  ;;  %v1647_v21 = vld [vmem:[#allocation8 + $0x178] sm:$0xff] }
 0x2cb   : > { %2466 = vmatpush1.bf16.msra.mxu1 %v2465_v22  ;;  %v1624_v22 = vld [vmem:[#allocation8 + $0xc0] sm:$0xff]  ;;  %2520 = vmatprep.subr.bf16.mxu0 %v2519_v56  ;;  %v2537_v56 = vpack.c.bf16 %v1642_v19, %v1640_v18 }
 0x2cc   : > { %2468 = vmatprep.subr.bf16.mxu1 %v2467_v57  ;;  %v1629_v57 = vld [vmem:[#allocation8 + $0xe8] sm:$0xff]  ;;  %v2521_v35 = vpack.c.bf16 %v1626_v32, %v1624_v22  ;;  %v2539_v22 = vpack.c.bf16 %v1647_v21, %v1645_v20  ;;  %v1644_v32 = vld [vmem:[#allocation8 + $0x160] sm:$0xff] }
 0x2cd   : > { %v2523_v38 = vpack.c.bf16 %v1631_v26, %v1629_v57 }
 0x2ce   : > { %2522 = vmatpush1.bf16.msra.mxu0 %v2521_v35  ;;  %v1661_v35 = vld [vmem:[#allocation8 + $0x1e8] sm:$0xff] }
 0x2cf   : > { %2470 = vmatpush1.bf16.msra.mxu1 %v2469_v39  ;;  %v1628_v39 = vld [vmem:[#allocation8 + $0xe0] sm:$0xff]  ;;  %2524 = vmatprep.subr.bf16.mxu0 %v2523_v38  ;;  %v1663_v38 = vld [vmem:[#allocation8 + $0x1f8] sm:$0xff] }
 0x2d0   : > { %2472 = vmatprep.subr.bf16.mxu1 %v2471_v46  ;;  %v1633_v46 = vld [vmem:[#allocation8 + $0x108] sm:$0xff]  ;;  %v2525_v55 = vpack.c.bf16 %v1630_v42, %v1628_v39  ;;  %v1660_v39 = vld [vmem:[#allocation8 + $0x1e0] sm:$0xff]  ;;  %v2555_v42 = vpack.c.bf16 %v1663_v38, %v1661_v35  ;;  %v1671_v35 = vld [vmem:[#allocation8 + $0x238] sm:$0xff] }
 0x2d1   : > { %v2527_v58 = vpack.c.bf16 %v1635_v47, %v1633_v46  ;;  %v1667_v46 = vld [vmem:[#allocation8 + $0x218] sm:$0xff] }
 0x2d2   : > { %2526 = vmatpush1.bf16.msra.mxu0 %v2525_v55 }
 0x2d3   : > { %2474 = vmatpush1.bf16.msra.mxu1 %v2473_v61  ;;  %v1632_v61 = vld [vmem:[#allocation8 + $0x100] sm:$0xff]  ;;  %2528 = vmatprep.subr.bf16.mxu0 %v2527_v58 }
 0x2d4   : > { %2476 = vmatprep.subr.bf16.mxu1 %v2475_v1  ;;  %v1637_v1 = vld [vmem:[#allocation8 + $0x128] sm:$0xff]  ;;  %v2529_v7 = vpack.c.bf16 %v1634_v62, %v1632_v61 }
 0x2d5   : > { %v2531_v8 = vpack.c.bf16 %v1639_v3, %v1637_v1 }
 0x2d6   : > { %2530 = vmatpush1.bf16.msra.mxu0 %v2529_v7 }
 0x2d7   : > { %2478 = vmatpush1.bf16.msra.mxu1 %v2477_v13  ;;  %v2493_v13 = vpack.c.bf16 %v1178_v6, %v1174_v5  ;;  %2532 = vmatprep.subr.bf16.mxu0 %v2531_v8 }
 0x2d8   : > { %2480 = vmatprep.subr.bf16.mxu1 %v2479_v16  ;;  %v2533_v16 = vpack.c.bf16 %v1638_v11, %v1636_v10  ;;  %v2939_v11 = vmov 1966171168  }
 0x2da   : > { %2534 = vmatpush1.bf16.msra.mxu0 %v2533_v16 }
 0x2db   : > { %2482 = vmatpush1.bf16.msra.mxu1 %v2481_v23  ;;  %2536 = vmatprep.subr.bf16.mxu0 %v2535_v17  ;;  %v1646_v23 = vld [vmem:[#allocation8 + $0x170] sm:$0xff] }
 0x2dc   : > { %2484 = vmatprep.subr.bf16.mxu1 %v2483_v28  ;;  %v2541_v57 = vpack.c.bf16 %v1646_v23, %v1644_v32  ;;  %v1650_v28 = vld [vmem:[#allocation8 + $0x190] sm:$0xff] }
 0x2de   : > { %2538 = vmatpush1.bf16.msra.mxu0 %v2537_v56 }
 0x2df   : > { %2486 = vmatpush1.bf16.msra.mxu1 %v2485_v43  ;;  %2540 = vmatprep.subr.bf16.mxu0 %v2539_v22  ;;  %v3325_v22 = vld [vmem:[%s3471_s7] sm:$0xf] }
 0x2e0   : > { %2488 = vmatprep.subr.bf16.mxu1 %v2487_v48 }
 0x2e2   : > { %2542 = vmatpush1.bf16.msra.mxu0 %v2541_v57 }
 0x2e3   : > { %2490 = vmatpush1.bf16.msra.mxu1 %v2489_v63 }
 0x2e4   : > { %2492 = vmatprep.subr.bf16.mxu1 %v2491_v4 }
 0x2e7   : > { %2494 = vmatpush1.bf16.msra.mxu1 %v2493_v13  ;;  %v1413_v13 = vunpack.c.l.s4 %v2939_v11 }
 0x2e9   : > { %v1414_v14 = vunpack.c.0.s8 %v1413_v13 }
 0x2ea   : > { %1358 = vmatmul.mubr.f32.vlgmr.msra.gmra.mrb[20].mxu1 %v3237_v33  ;;  %v1649_v33 = vld [vmem:[#allocation8 + $0x188] sm:$0xff] }
 0x2eb   : > { %1363 = vmatprep.mubr.f32.mxu1 %v3241_v36  ;;  %v1651_v36 = vld [vmem:[#allocation8 + $0x198] sm:$0xff]  ;;  %v1417_v15 = vsub.s32 %v1414_v14, %v3222_v24 }
 0x2ec   : > { %v2543_v26 = vpack.c.bf16 %v1651_v36, %v1649_v33  ;;  %v3337_v36 = vrot.slane %v3325_v22, %v3225_v25 }
 0x2ee   : > { %1364 = vmatmul.mubr.f32.gmra.mrb[22].mxu1 %v3243_v37  ;;  %v1648_v37 = vld [vmem:[#allocation8 + $0x180] sm:$0xff]  ;;  %2544 = vmatprep.subr.bf16.mxu0 %v2543_v26  ;;  %v3341_v26 = vrot.slane %v3325_v22, %v3231_v27 }
 0x2ef   : > { %1369 = vmatprep.mubr.f32.mxu1 %v3247_v40  ;;  %v2545_v40 = vpack.c.bf16 %v1650_v28, %v1648_v37 }
 0x2f1   : > { %2546 = vmatpush1.bf16.msra.mxu0 %v2545_v40 }
 0x2f2   : > { %1370 = vmatmul.mubr.f32.gmra.mrb[24].mxu1 %v3249_v41  ;;  %v1653_v41 = vld [vmem:[#allocation8 + $0x1a8] sm:$0xff] }
 0x2f3   : > { %1375 = vmatprep.mubr.f32.mxu1 %v3253_v44  ;;  %v1655_v44 = vld [vmem:[#allocation8 + $0x1b8] sm:$0xff] }
 0x2f6   : > { %1376 = vmatmul.mubr.f32.gmra.mrb[26].mxu1 %v3255_v45  ;;  %v2547_v45 = vpack.c.bf16 %v1655_v44, %v1653_v41 }
 0x2f7   : > { %1381 = vmatprep.mubr.f32.mxu1 %v3264_v51  ;;  %v1652_v51 = vld [vmem:[#allocation8 + $0x1a0] sm:$0xff] }
 0x2f8   : > { %2548 = vmatprep.subr.bf16.mxu0 %v2547_v45  ;;  %v1664_v45 = vld [vmem:[#allocation8 + $0x200] sm:$0xff] }
 0x2fa   : > { %1382 = vmatmul.mubr.f32.gmra.mrb[28].mxu1 %v3267_v53  ;;  %v2549_v53 = vpack.c.bf16 %v1654_v29, %v1652_v51  ;;  %v1666_v51 = vld [vmem:[#allocation8 + $0x210] sm:$0xff] }
 0x2fb   : > { %1387 = vmatprep.mubr.f32.mxu1 %v3273_v59  ;;  %v1657_v59 = vld [vmem:[#allocation8 + $0x1c8] sm:$0xff] }
 0x2fc   : > { %2550 = vmatpush1.bf16.msra.mxu0 %v2549_v53 }
 0x2fe   : > { %1388 = vmatmul.mubr.f32.gmra.mrb[30].mxu1 %v3275_v60  ;;  %v2551_v60 = vpack.c.bf16 %v1659_v30, %v1657_v59 }
 0x2ff   : > { %1393 = vmatprep.mubr.f32.mxu1 %v3281_v2  ;;  %v2553_v2 = vpack.c.bf16 %v1658_v34, %v1656_v31 }
 0x300   : > { %2552 = vmatprep.subr.bf16.mxu0 %v2551_v60 }
 0x301   : > { %2554 = vmatpush1.bf16.msra.mxu0 %v2553_v2  ;;  %v1669_v2 = vld [vmem:[#allocation8 + $0x228] sm:$0xff] }
 0x302   : > { %1394 = vmatmul.mubr.f32.gmra.mrb[32].mxu1 %v3278_v0  ;;  %v1662_v0 = vld [vmem:[#allocation8 + $0x1f0] sm:$0xff]  ;;  %2556 = vmatprep.subr.bf16.mxu0 %v2555_v42 }
 0x303   : > { %1399 = vmatprep.mubr.f32.mxu1 %v3293_v12  ;;  %v2557_v43 = vpack.c.bf16 %v1662_v0, %v1660_v39  ;;  %v1665_v12 = vld [vmem:[#allocation8 + $0x208] sm:$0xff]  ;;  %v2561_v0 = vpack.c.bf16 %v1666_v51, %v1664_v45  ;;  %v1682_v45 = vld [vmem:[#allocation8 + $0x290] sm:$0xff] }
 0x304   : > { %v2559_v47 = vpack.c.bf16 %v1667_v46, %v1665_v12  ;;  %v2563_v12 = vpack.c.bf16 %v1671_v35, %v1669_v2  ;;  %v1684_v2 = vld [vmem:[#allocation8 + $0x2a0] sm:$0xff]  ;;  %v1686_v35 = vld [vmem:[#allocation8 + $0x2b0] sm:$0xff] }
 0x305   : > { %2558 = vmatpush1.bf16.msra.mxu0 %v2557_v43 }
 0x306   : > { %1400 = vmatmul.mubr.f32.gmra.mrb[34].mxu1 %v3289_v9  ;;  %2560 = vmatprep.subr.bf16.mxu0 %v2559_v47  ;;  %v1668_v47 = vld [vmem:[#allocation8 + $0x220] sm:$0xff] }
 0x312   : > { %v1246_v48 = vpop.f32.mrb[8].mxu0 }
 0x313   : > { %v1248_v49 = vpop.f32.mrb[9].mxu0 }
 0x316   : > { %v1252_v50 = vpop.f32.mrb[10].mxu0 }
 0x317   : > { %v1254_v52 = vpop.f32.mrb[11].mxu0 }
 0x31a   : > { %v1258_v9 = vpop.f32.mrb[12].mxu0 }
 0x31b   : > { %v1260_v54 = vpop.f32.mrb[13].mxu0 }
 0x31e   : > { %v1264_v55 = vpop.f32.mrb[14].mxu0 }
 0x31f   : > { %v1266_v58 = vpop.f32.mrb[15].mxu0 }
 0x322   : > { %v1270_v61 = vpop.f32.mrb[16].mxu0 }
 0x323   : > { %v1272_v62 = vpop.f32.mrb[17].mxu0 }
 0x326   : > { %v1276_v63 = vpop.f32.mrb[18].mxu0 }
 0x327   : > { %v1278_v1 = vpop.f32.mrb[19].mxu0 }
 0x32a   : > { %v1282_v3 = vpop.f32.mrb[20].mxu0 }
 0x32b   : > { %v1284_v4 = vpop.f32.mrb[21].mxu0 }
 0x32e   : > { %v1288_v5 = vpop.f32.mrb[22].mxu0 }
 0x32f   : > { %v1290_v6 = vpop.f32.mrb[23].mxu0 }
 0x33d   : > { %v976_v7 = vpop.f32.mrb[16].mxu1 }
 0x33e   : > { %v978_v8 = vpop.f32.mrb[17].mxu1 }
 0x33f   : > { %v1410_v10 = vcombine.low %v976_v7, %v978_v8 }
 0x341   : > { %v1418_v19 = vrot.slane %v1410_v10, %v1417_v15 }
 0x37d   : > { %v1047_v16 = vpop.f32.mrb[18].mxu1 }
 0x37e   : > { %v1049_v17 = vpop.f32.mrb[19].mxu1 }
 0x37f   : > { %v1411_v18 = vcombine.low %v1047_v16, %v1049_v17 }
 0x381   : > { %v1425_v20 = vrot.slane %v1411_v18, %v1417_v15 }
 0x383   : > { %v1426_v21 = vcombine.low %v1418_v19, %v1425_v20  ;;  %v1427_v56 = vcombine.high %v1418_v19, %v1425_v20  ;;  %v1676_v19 = vld [vmem:[#allocation8 + $0x260] sm:$0xff]  ;;  %v1678_v20 = vld [vmem:[#allocation8 + $0x270] sm:$0xff] }
 0x385   : > { %v3327_v32 = vrot.slane %v1426_v21, %v1417_v15  ;;  %v3329_v23 = vrot.slane %v1427_v56, %v1417_v15 }
 0x387   : > { %v1445_v57 = vrot.slane %v3327_v32, %v3231_v27  ;;  %v1449_v33 = vrot.slane %v3327_v32, %v3225_v25  ;;  %v1465_v37 = vrot.slane %v3329_v23, %v3225_v25  ;;  %v1461_v38 = vrot.slane %v3329_v23, %v3231_v27 }
 0x389   : > { %v1483_v28 = vadd.f32 %v1449_v33, %v1248_v49  ;;  %v1482_v40 = vadd.f32 %v1445_v57, %v1246_v48  ;;  %v1487_v41 = vadd.f32 %v1449_v33, %v1254_v52  ;;  %v1486_v44 = vadd.f32 %v1445_v57, %v1252_v50  ;;  %v1670_v48 = vld [vmem:[#allocation8 + $0x230] sm:$0xff]  ;;  %v1673_v50 = vld [vmem:[#allocation8 + $0x248] sm:$0xff]  ;;  %v1675_v52 = vld [vmem:[#allocation8 + $0x258] sm:$0xff] }
 0x38a   : > { %v1491_v29 = vadd.f32 %v1449_v33, %v1260_v54  ;;  %v1490_v53 = vadd.f32 %v1445_v57, %v1258_v9  ;;  %v1495_v59 = vadd.f32 %v1449_v33, %v1266_v58  ;;  %v1494_v30 = vadd.f32 %v1445_v57, %v1264_v55  ;;  %v1681_v57 = vld [vmem:[#allocation8 + $0x288] sm:$0xff]  ;;  %v1683_v33 = vld [vmem:[#allocation8 + $0x298] sm:$0xff] }
 0x38b   : > { %v1537_v60 = vadd.f32 %v3337_v36, %v1483_v28  ;;  %v1536_v31 = vadd.f32 %v3341_v26, %v1482_v40  ;;  %v1541_v34 = vadd.f32 %v3337_v36, %v1487_v41  ;;  %v1540_v46 = vadd.f32 %v3341_v26, %v1486_v44  ;;  %v1680_v44 = vld [vmem:[#allocation8 + $0x280] sm:$0xff] }
 0x38c   : > { %v1545_v49 = vadd.f32 %v3337_v36, %v1491_v29  ;;  %v1499_v9 = vadd.f32 %v1465_v37, %v1272_v62  ;;  %v1498_v54 = vadd.f32 %v1461_v38, %v1270_v61  ;;  %v1503_v55 = vadd.f32 %v1465_v37, %v1278_v1  ;;  %v1672_v62 = vld [vmem:[#allocation8 + $0x240] sm:$0xff]  ;;  %v1674_v61 = vld [vmem:[#allocation8 + $0x250] sm:$0xff] }
 0x38d   : > { %v1569_v39 = vmax.f32 %v1537_v60, 0.0  ;;  %v1568_v42 = vmax.f32 %v1536_v31, 0.0  ;;  %v1573_v43 = vmax.f32 %v1541_v34, 0.0  ;;  %v1502_v58 = vadd.f32 %v1461_v38, %v1276_v63 }
 0x38e   : > { %v1507_v7 = vadd.f32 %v1465_v37, %v1284_v4  ;;  %v3352_v8 = vadd.f32 %v1461_v38, %v1282_v3  ;;  %v3354_v10 = vadd.f32 %v1465_v37, %v1290_v6  ;;  %v3356_v11 = vadd.f32 %v1461_v38, %v1288_v5  ;;  %v1677_v4 = vld [vmem:[#allocation8 + $0x268] sm:$0xff]  ;;  %v1679_v3 = vld [vmem:[#allocation8 + $0x278] sm:$0xff] }
 0x38f   : > { %1804 = vmatprep.mubr.f32.mxu0 %v1569_v39  ;;  %v2565_v13 = vpack.c.bf16 %v1670_v48, %v1668_v47  ;;  %v1572_v14 = vmax.f32 %v1540_v46, 0.0  ;;  %v2567_v15 = vpack.c.bf16 %v1675_v52, %v1673_v50  ;;  %v1544_v16 = vadd.f32 %v3341_v26, %v1490_v53  ;;  %v1685_v53 = vld [vmem:[#allocation8 + $0x2a8] sm:$0xff]  ;;  %v1688_v48 = vld [vmem:[#allocation8 + $0x2c0] sm:$0xff] }
 0x390   : > { %1805 = vmatmul.mubr.f32.vlgmr.msra.gmra.mrb[24].mxu0 %v1568_v42  ;;  %v1577_v1 = vmax.f32 %v1545_v49, 0.0  ;;  %v1549_v63 = vadd.f32 %v3337_v36, %v1495_v59  ;;  %v2569_v5 = vpack.c.bf16 %v1674_v61, %v1672_v62  ;;  %v2571_v17 = vpack.c.bf16 %v1679_v3, %v1677_v4  ;;  %v1687_v59 = vld [vmem:[#allocation8 + $0x2b8] sm:$0xff]  ;;  %v1689_v42 = vld [vmem:[#allocation8 + $0x2c8] sm:$0xff]  ;;  %v1690_v49 = vld [vmem:[#allocation8 + $0x2d0] sm:$0xff] }
 0x391   : > { %2562 = vmatpush1.bf16.msra.mxu0 %v2561_v0  ;;  %1810 = vmatprep.mubr.f32.mxu0 %v1573_v43  ;;  %v1576_v6 = vmax.f32 %v1544_v16, 0.0  ;;  %v1548_v18 = vadd.f32 %v3341_v26, %v1494_v30  ;;  %v1553_v56 = vadd.f32 %v3337_v36, %v1499_v9  ;;  %v2573_v37 = vpack.c.bf16 %v1678_v20, %v1676_v19  ;;  %v1691_v0 = vld [vmem:[#allocation8 + $0x2d8] sm:$0xff]  ;;  %v1693_v9 = vld [vmem:[#allocation8 + $0x2e8] sm:$0xff] }
 0x392   : > { %2564 = vmatprep.subr.bf16.mxu0 %v2563_v12  ;;  %v1581_v21 = vmax.f32 %v1549_v63, 0.0  ;;  %v2575_v40 = vpack.c.bf16 %v1683_v33, %v1681_v57  ;;  %v1552_v41 = vadd.f32 %v3341_v26, %v1498_v54  ;;  %v1557_v29 = vadd.f32 %v3337_v36, %v1503_v55  ;;  %v1695_v54 = vld [vmem:[#allocation8 + $0x2f8] sm:$0xff]  ;;  %v1697_v16 = vld [vmem:[#allocation8 + $0x308] sm:$0xff]  ;;  %v1698_v63 = vld [vmem:[#allocation8 + $0x310] sm:$0xff] }
 0x393   : > { %v1580_v28 = vmax.f32 %v1548_v18, 0.0  ;;  %v1585_v51 = vmax.f32 %v1553_v56, 0.0  ;;  %v2577_v30 = vpack.c.bf16 %v1682_v45, %v1680_v44  ;;  %v2579_v31 = vpack.c.bf16 %v1687_v59, %v1685_v53  ;;  %v1699_v62 = vld [vmem:[#allocation8 + $0x318] sm:$0xff]  ;;  %v1701_v4 = vld [vmem:[#allocation8 + $0x328] sm:$0xff]  ;;  %v1706_v56 = vld [vmem:[#allocation8 + $0x350] sm:$0xff] }
 0x394   : > { %1811 = vmatmul.mubr.f32.gmra.mrb[26].mxu0 %v1572_v14  ;;  %v1584_v60 = vmax.f32 %v1552_v41, 0.0  ;;  %v1556_v34 = vadd.f32 %v3341_v26, %v1502_v58  ;;  %v1589_v38 = vmax.f32 %v1557_v29, 0.0  ;;  %v1561_v39 = vadd.f32 %v3337_v36, %v1507_v7  ;;  %v1692_v14 = vld [vmem:[#allocation8 + $0x2e0] sm:$0xff]  ;;  %v1703_v3 = vld [vmem:[#allocation8 + $0x338] sm:$0xff]  ;;  %v1709_v57 = vld [vmem:[#allocation8 + $0x368] sm:$0xff] }
 0x395   : > { %2566 = vmatpush1.bf16.msra.mxu0 %v2565_v13  ;;  %1816 = vmatprep.mubr.f32.mxu0 %v1577_v1  ;;  %v2581_v43 = vpack.c.bf16 %v1686_v35, %v1684_v2  ;;  %v2583_v46 = vpack.c.bf16 %v1691_v0, %v1689_v42  ;;  %v1560_v47 = vadd.f32 %v3341_v26, %v3352_v8  ;;  %v1694_v8 = vld [vmem:[#allocation8 + $0x2f0] sm:$0xff]  ;;  %v1696_v1 = vld [vmem:[#allocation8 + $0x300] sm:$0xff]  ;;  %v1707_v18 = vld [vmem:[#allocation8 + $0x358] sm:$0xff]  ;;  %v3376_v53 = vsub.s32 3, %v3222_v24 }
 0x396   : > { %2568 = vmatprep.subr.bf16.mxu0 %v2567_v15  ;;  %v1588_v12 = vmax.f32 %v1556_v34, 0.0  ;;  %v1593_v50 = vmax.f32 %v1561_v39, 0.0  ;;  %v1565_v52 = vadd.f32 %v3337_v36, %v3354_v10  ;;  %v2585_v55 = vpack.c.bf16 %v1690_v49, %v1688_v48  ;;  %v1711_v33 = vld [vmem:[#allocation8 + $0x378] sm:$0xff]  ;;  %v1710_v41 = vld [vmem:[#allocation8 + $0x370] sm:$0xff]  ;;  %v1713_v44 = vld [vmem:[#allocation8 + $0x388] sm:$0xff] }
 0x397   : > { %v1592_v58 = vmax.f32 %v1560_v47, 0.0  ;;  %v2587_v7 = vpack.c.bf16 %v1695_v54, %v1693_v9  ;;  %v1564_v13 = vadd.f32 %v3341_v26, %v3356_v11  ;;  %v2589_v36 = vpack.c.bf16 %v1694_v8, %v1692_v14  ;;  %v1700_v11 = vld [vmem:[#allocation8 + $0x320] sm:$0xff]  ;;  %v1715_v45 = vld [vmem:[#allocation8 + $0x398] sm:$0xff]  ;;  %v1718_v48 = vld [vmem:[#allocation8 + $0x3b0] sm:$0xff] }
 0x398   : > { %1817 = vmatmul.mubr.f32.gmra.mrb[28].mxu0 %v1576_v6  ;;  %v1597_v15 = vmax.f32 %v1565_v52, 0.0  ;;  %v2591_v61 = vpack.c.bf16 %v1699_v62, %v1697_v16  ;;  %v2595_v26 = vpack.c.bf16 %v1703_v3, %v1701_v4  ;;  %v1702_v6 = vld [vmem:[#allocation8 + $0x330] sm:$0xff]  ;;  %v2607_v59 = vpack.c.bf16 %v1715_v45, %v1713_v44  ;;  %v1719_v34 = vld [vmem:[#allocation8 + $0x3b8] sm:$0xff]  ;;  %v1716_v47 = vld [vmem:[#allocation8 + $0x3a0] sm:$0xff] }
 0x399   : > { %2570 = vmatpush1.bf16.msra.mxu0 %v2569_v5  ;;  %1822 = vmatprep.mubr.f32.mxu0 %v1581_v21  ;;  %v1596_v10 = vmax.f32 %v1564_v13, 0.0  ;;  %v2593_v5 = vpack.c.bf16 %v1698_v63, %v1696_v1  ;;  %v2597_v19 = vpack.c.bf16 %v1702_v6, %v1700_v11  ;;  %v1704_v21 = vld [vmem:[#allocation8 + $0x340] sm:$0xff]  ;;  %v1457_v39 = vrot.slane %v3327_v32, %v3376_v53  ;;  %v1723_v52 = vld [vmem:[#allocation8 + $0x3d8] sm:$0xff]  ;;  %v1722_v14 = vld [vmem:[#allocation8 + $0x3d0] sm:$0xff] }
 0x39a   : > { %2572 = vmatprep.subr.bf16.mxu0 %v2571_v17  ;;  %v1705_v17 = vld [vmem:[#allocation8 + $0x348] sm:$0xff]  ;;  %v3388_v42 = vrot.slane %v3325_v22, %v3376_v53  ;;  %v1720_v13 = vld [vmem:[#allocation8 + $0x3c0] sm:$0xff]  ;;  %v1727_v62 = vld [vmem:[#allocation8 + $0x3f8] sm:$0xff] }
 0x39b   : > { %v2599_v20 = vpack.c.bf16 %v1707_v18, %v1705_v17  ;;  %v1725_v16 = vld [vmem:[#allocation8 + $0x3e8] sm:$0xff]  ;;  %v1724_v3 = vld [vmem:[#allocation8 + $0x3e0] sm:$0xff] }
 0x39c   : > { %1823 = vmatmul.mubr.f32.gmra.mrb[30].mxu0 %v1580_v28  ;;  %v2603_v28 = vpack.c.bf16 %v1711_v33, %v1709_v57  ;;  %v2619_v4 = vpack.c.bf16 %v1727_v62, %v1725_v16 }
 0x39d   : > { %2574 = vmatpush1.bf16.msra.mxu0 %v2573_v37  ;;  %1828 = vmatprep.mubr.f32.mxu0 %v1585_v51  ;;  %v2601_v37 = vpack.c.bf16 %v1706_v56, %v1704_v21  ;;  %v3373_v51 = vsub.s32 2, %v3222_v24 }
 0x39e   : > { %2576 = vmatprep.subr.bf16.mxu0 %v2575_v40  ;;  %v1708_v40 = vld [vmem:[#allocation8 + $0x360] sm:$0xff] }
 0x39f   : > { %v2605_v29 = vpack.c.bf16 %v1710_v41, %v1708_v40  ;;  %v1453_v2 = vrot.slane %v3327_v32, %v3373_v51  ;;  %v3382_v35 = vrot.slane %v3325_v22, %v3373_v51  ;;  %v1469_v57 = vrot.slane %v3329_v23, %v3373_v51 }
 0x3a0   : > { %1829 = vmatmul.mubr.f32.gmra.mrb[32].mxu0 %v1584_v60  ;;  %v1714_v60 = vld [vmem:[#allocation8 + $0x390] sm:$0xff] }
 0x3a1   : > { %2578 = vmatpush1.bf16.msra.mxu0 %v2577_v30  ;;  %1834 = vmatprep.mubr.f32.mxu0 %v1589_v38  ;;  %v1712_v30 = vld [vmem:[#allocation8 + $0x380] sm:$0xff] }
 0x3a2   : > { %2580 = vmatprep.subr.bf16.mxu0 %v2579_v31  ;;  %v1717_v31 = vld [vmem:[#allocation8 + $0x3a8] sm:$0xff]  ;;  %v2609_v0 = vpack.c.bf16 %v1714_v60, %v1712_v30 }
 0x3a4   : > { %1835 = vmatmul.mubr.f32.gmra.mrb[34].mxu0 %v1588_v12 }
 0x3a5   : > { %2582 = vmatpush1.bf16.msra.mxu0 %v2581_v43  ;;  %1840 = vmatprep.mubr.f32.mxu0 %v1593_v50  ;;  %v1721_v50 = vld [vmem:[#allocation8 + $0x3c8] sm:$0xff] }
 0x3a6   : > { %2584 = vmatprep.subr.bf16.mxu0 %v2583_v46  ;;  %v2611_v46 = vpack.c.bf16 %v1719_v34, %v1717_v31 }
 0x3a8   : > { %1841 = vmatmul.mubr.f32.gmra.mrb[36].mxu0 %v1592_v58 }
 0x3a9   : > { %2586 = vmatpush1.bf16.msra.mxu0 %v2585_v55  ;;  %1846 = vmatprep.mubr.f32.mxu0 %v1597_v15  ;;  %v2613_v55 = vpack.c.bf16 %v1718_v48, %v1716_v47 }
 0x3aa   : > { %2588 = vmatprep.subr.bf16.mxu0 %v2587_v7  ;;  %v2615_v7 = vpack.c.bf16 %v1723_v52, %v1721_v50 }
 0x3ac   : > { %1847 = vmatmul.mubr.f32.gmra.mrb[38].mxu0 %v1596_v10 }
 0x3ad   : > { %2590 = vmatpush1.bf16.msra.mxu0 %v2589_v36 }
 0x3ae   : > { %2592 = vmatprep.subr.bf16.mxu0 %v2591_v61  ;;  %v2617_v61 = vpack.c.bf16 %v1722_v14, %v1720_v13 }
 0x3b1   : > { %2594 = vmatpush1.bf16.msra.mxu0 %v2593_v5  ;;  %v1726_v5 = vld [vmem:[#allocation8 + $0x3f0] sm:$0xff] }
 0x3b2   : > { %2596 = vmatprep.subr.bf16.mxu0 %v2595_v26  ;;  %v2621_v17 = vpack.c.bf16 %v1726_v5, %v1724_v3 }
 0x3b5   : > { %2598 = vmatpush1.bf16.msra.mxu0 %v2597_v19 }
 0x3b6   : > { %2600 = vmatprep.subr.bf16.mxu0 %v2599_v20 }
 0x3b9   : > { %2602 = vmatpush1.bf16.msra.mxu0 %v2601_v37  ;;  %v1473_v37 = vrot.slane %v3329_v23, %v3376_v53 }
 0x3ba   : > { %2604 = vmatprep.subr.bf16.mxu0 %v2603_v28 }
 0x3bd   : > { %2606 = vmatpush1.bf16.msra.mxu0 %v2605_v29  ;;  %v1359_v38 = vpop.f32.mrb[20].mxu1 }
 0x3be   : > { %v1484_v43 = vadd.f32 %v1453_v2, %v1359_v38  ;;  %v1361_v12 = vpop.f32.mrb[21].mxu1  ;;  %2608 = vmatprep.subr.bf16.mxu0 %v2607_v59 }
 0x3bf   : > { %v1485_v49 = vadd.f32 %v1457_v39, %v1361_v12 }
 0x3c0   : > { %v1538_v9 = vadd.f32 %v3382_v35, %v1484_v43 }
 0x3c1   : > { %v1539_v54 = vadd.f32 %v3388_v42, %v1485_v49  ;;  %2610 = vmatpush1.bf16.msra.mxu0 %v2609_v0  ;;  %v1365_v32 = vpop.f32.mrb[22].mxu1 }
 0x3c2   : > { %v1488_v58 = vadd.f32 %v1453_v2, %v1365_v32  ;;  %v1367_v22 = vpop.f32.mrb[23].mxu1  ;;  %2612 = vmatprep.subr.bf16.mxu0 %v2611_v46  ;;  %v1570_v28 = vmax.f32 %v1538_v9, 0.0 }
 0x3c3   : > { %v1571_v8 = vmax.f32 %v1539_v54, 0.0  ;;  %v1489_v15 = vadd.f32 %v1457_v39, %v1367_v22 }
 0x3c4   : > { %v1542_v36 = vadd.f32 %v3382_v35, %v1488_v58 }
 0x3c5   : > { %2614 = vmatpush1.bf16.msra.mxu0 %v2613_v55  ;;  %v1371_v10 = vpop.f32.mrb[24].mxu1  ;;  %1917 = vmatprep.mubr.f32.mxu0 %v1571_v8  ;;  %v1543_v20 = vadd.f32 %v3388_v42, %v1489_v15 }
 0x3c6   : > { %v1492_v1 = vadd.f32 %v1453_v2, %v1371_v10  ;;  %v1373_v63 = vpop.f32.mrb[25].mxu1  ;;  %2616 = vmatprep.subr.bf16.mxu0 %v2615_v7  ;;  %v1574_v60 = vmax.f32 %v1542_v36, 0.0 }
 0x3c7   : > { %v1493_v26 = vadd.f32 %v1457_v39, %v1373_v63  ;;  %v1575_v44 = vmax.f32 %v1543_v20, 0.0 }
 0x3c8   : > { %v1546_v11 = vadd.f32 %v3382_v35, %v1492_v1 }
 0x3c9   : > { %2618 = vmatpush1.bf16.msra.mxu0 %v2617_v61  ;;  %v1377_v6 = vpop.f32.mrb[26].mxu1  ;;  %v1547_v45 = vadd.f32 %v3388_v42, %v1493_v26 }
 0x3ca   : > { %v1496_v18 = vadd.f32 %v1453_v2, %v1377_v6  ;;  %v1379_v19 = vpop.f32.mrb[27].mxu1  ;;  %2620 = vmatprep.subr.bf16.mxu0 %v2619_v4 }
 0x3cb   : > { %v1497_v21 = vadd.f32 %v1457_v39, %v1379_v19  ;;  %v1579_v34 = vmax.f32 %v1547_v45, 0.0  ;;  %v1578_v39 = vmax.f32 %v1546_v11, 0.0 }
 0x3cc   : > { %v1550_v56 = vadd.f32 %v3382_v35, %v1496_v18 }
 0x3cd   : > { %2622 = vmatpush1.bf16.msra.mxu0 %v2621_v17  ;;  %v1383_v33 = vpop.f32.mrb[28].mxu1  ;;  %v1551_v2 = vadd.f32 %v3388_v42, %v1497_v21 }
 0x3ce   : > { %v1500_v40 = vadd.f32 %v1469_v57, %v1383_v33  ;;  %v1385_v41 = vpop.f32.mrb[29].mxu1  ;;  %v1582_v50 = vmax.f32 %v1550_v56, 0.0 }
 0x3cf   : > { %v1501_v29 = vadd.f32 %v1473_v37, %v1385_v41  ;;  %v1583_v12 = vmax.f32 %v1551_v2, 0.0 }
 0x3d0   : > { %v1554_v59 = vadd.f32 %v3382_v35, %v1500_v40  ;;  %1918 = vmatmul.mubr.f32.vlgmr.msra.gmra.mrb[24].mxu0 %v1570_v28 }
 0x3d1   : > { %1923 = vmatprep.mubr.f32.mxu0 %v1575_v44  ;;  %v1389_v30 = vpop.f32.mrb[30].mxu1  ;;  %v1555_v46 = vadd.f32 %v3388_v42, %v1501_v29 }
 0x3d2   : > { %v1504_v31 = vadd.f32 %v1469_v57, %v1389_v30  ;;  %v1391_v51 = vpop.f32.mrb[31].mxu1  ;;  %v1586_v22 = vmax.f32 %v1554_v59, 0.0 }
 0x3d3   : > { %v1505_v38 = vadd.f32 %v1473_v37, %v1391_v51  ;;  %v1587_v54 = vmax.f32 %v1555_v46, 0.0 }
 0x3d4   : > { %v1558_v23 = vadd.f32 %v3382_v35, %v1504_v31  ;;  %1924 = vmatmul.mubr.f32.gmra.mrb[26].mxu0 %v1574_v60 }
 0x3d5   : > { %1929 = vmatprep.mubr.f32.mxu0 %v1579_v34  ;;  %v1395_v53 = vpop.f32.mrb[32].mxu1  ;;  %v1559_v32 = vadd.f32 %v3388_v42, %v1505_v38 }
 0x3d6   : > { %v1508_v0 = vadd.f32 %v1469_v57, %v1395_v53  ;;  %v1397_v43 = vpop.f32.mrb[33].mxu1  ;;  %v1590_v14 = vmax.f32 %v1558_v23, 0.0 }
 0x3d7   : > { %v1509_v47 = vadd.f32 %v1473_v37, %v1397_v43  ;;  %v1591_v7 = vmax.f32 %v1559_v32, 0.0 }
 0x3d8   : > { %v1562_v48 = vadd.f32 %v3382_v35, %v1508_v0  ;;  %1930 = vmatmul.mubr.f32.gmra.mrb[28].mxu0 %v1578_v39 }
 0x3d9   : > { %1935 = vmatprep.mubr.f32.mxu0 %v1583_v12  ;;  %v1401_v49 = vpop.f32.mrb[34].mxu1  ;;  %v1563_v13 = vadd.f32 %v3388_v42, %v1509_v47 }
 0x3da   : > { %v1512_v52 = vadd.f32 %v1469_v57, %v1401_v49  ;;  %v1403_v9 = vpop.f32.mrb[35].mxu1  ;;  %v1594_v16 = vmax.f32 %v1562_v48, 0.0 }
 0x3db   : > { %v1513_v55 = vadd.f32 %v1473_v37, %v1403_v9  ;;  %v1595_v8 = vmax.f32 %v1563_v13, 0.0 }
 0x3dc   : > { %v1566_v58 = vadd.f32 %v3382_v35, %v1512_v52  ;;  %1936 = vmatmul.mubr.f32.gmra.mrb[30].mxu0 %v1582_v50  ;;  %v1728_v35 = vld [vmem:[%s3473_s9] sm:$0x3] }
 0x3dd   : > { %1941 = vmatprep.mubr.f32.mxu0 %v1587_v54  ;;  %v1567_v15 = vadd.f32 %v3388_v42, %v1513_v55  ;;  %v1733_v61 = vrot.slane %v1728_v35, %v3231_v27  ;;  %v1737_v63 = vrot.slane %v1728_v35, %v3225_v25 }
 0x3de   : > { %v1598_v36 = vmax.f32 %v1566_v58, 0.0 }
 0x3df   : > { %v1599_v62 = vmax.f32 %v1567_v15, 0.0 }
 0x3e0   : > { %1942 = vmatmul.mubr.f32.gmra.mrb[32].mxu0 %v1586_v22 }
 0x3e1   : > { %1947 = vmatprep.mubr.f32.mxu0 %v1591_v7 }
 0x3e4   : > { %1948 = vmatmul.mubr.f32.gmra.mrb[34].mxu0 %v1590_v14 }
 0x3e5   : > { %1953 = vmatprep.mubr.f32.mxu0 %v1595_v8 }
 0x3e8   : > { %1954 = vmatmul.mubr.f32.gmra.mrb[36].mxu0 %v1594_v16 }
 0x3e9   : > { %1959 = vmatprep.mubr.f32.mxu0 %v1599_v62 }
 0x3ec   : > { %1960 = vmatmul.mubr.f32.gmra.mrb[38].mxu0 %v1598_v36 }
 0x4a3   : > { %v1919_v10 = vpop.f32.mrb[24].mxu0 }
 0x4a4   : > { %v1921_v1 = vpop.f32.mrb[25].mxu0  ;;  %v2623_v42 = vadd.f32 %v1919_v10, %v1733_v61 }
 0x4a5   : > { %v2624_v26 = vadd.f32 %v1921_v1, %v1737_v63  ;;  %v2940_v1 = vmov 1983009808  }
 0x4a7   : > { %v1925_v4 = vpop.f32.mrb[26].mxu0 }
 0x4a8   : > { %v2625_v3 = vadd.f32 %v1925_v4, %v1733_v61  ;;  %v1927_v5 = vpop.f32.mrb[27].mxu0  ;;  %v2008_v4 = vunpack.c.l.s4 %v2940_v1 }
 0x4a9   : > { %v2626_v11 = vadd.f32 %v1927_v5, %v1737_v63 }
 0x4aa   : > { %v1966_v6 = vmax.f32 %v2623_v42, %v2625_v3 }
 0x4ab   : > { %v1975_v17 = vmax.f32 %v2624_v26, %v2626_v11  ;;  %v1931_v18 = vpop.f32.mrb[28].mxu0  ;;  %v2009_v11 = vunpack.c.0.s8 %v2008_v4 }
 0x4ac   : > { %v2627_v19 = vadd.f32 %v1931_v18, %v1733_v61  ;;  %v1933_v20 = vpop.f32.mrb[29].mxu0 }
 0x4ad   : > { %v2628_v21 = vadd.f32 %v1933_v20, %v1737_v63 }
 0x4ae   : > { %v1967_v56 = vmax.f32 %v1966_v6, %v2627_v19 }
 0x4af   : > { %v1976_v57 = vmax.f32 %v1975_v17, %v2628_v21  ;;  %v1937_v33 = vpop.f32.mrb[30].mxu0  ;;  %v2012_v17 = vsub.s32 %v2009_v11, %v3222_v24 }
 0x4b0   : > { %v2629_v37 = vadd.f32 %v1937_v33, %v1733_v61  ;;  %v1939_v27 = vpop.f32.mrb[31].mxu0 }
 0x4b1   : > { %v2630_v28 = vadd.f32 %v1939_v27, %v1737_v63 }
 0x4b2   : > { %v1968_v40 = vmax.f32 %v1967_v56, %v2629_v37 }
 0x4b3   : > { %v1977_v25 = vmax.f32 %v1976_v57, %v2630_v28  ;;  %v1943_v41 = vpop.f32.mrb[32].mxu0 }
 0x4b4   : > { %v1969_v44 = vrot.slane %v1968_v40, 4  ;;  %v1945_v45 = vpop.f32.mrb[33].mxu0  ;;  %v2631_v51 = vadd.f32 %v1943_v41, %v1733_v61 }
 0x4b5   : > { %v1978_v29 = vrot.slane %v1977_v25, 4  ;;  %v2632_v23 = vadd.f32 %v1945_v45, %v1737_v63 }
 0x4b6   : > { %v1970_v59 = vmax.f32 %v1968_v40, %v1969_v44 }
 0x4b7   : > { %v1979_v30 = vmax.f32 %v1977_v25, %v1978_v29  ;;  %v1949_v60 = vpop.f32.mrb[34].mxu0 }
 0x4b8   : > { %v1971_v31 = vrot.slane %v1970_v59, 2  ;;  %v2633_v34 = vadd.f32 %v1949_v60, %v1733_v61  ;;  %v1951_v2 = vpop.f32.mrb[35].mxu0 }
 0x4b9   : > { %v1980_v38 = vrot.slane %v1979_v30, 2  ;;  %v2634_v53 = vadd.f32 %v1951_v2, %v1737_v63 }
 0x4ba   : > { %v1972_v39 = vmax.f32 %v1970_v59, %v1971_v31  ;;  %v1984_v0 = vmax.f32 %v2631_v51, %v2633_v34 }
 0x4bb   : > { %v1981_v43 = vmax.f32 %v1979_v30, %v1980_v38  ;;  %v1993_v12 = vmax.f32 %v2632_v23, %v2634_v53  ;;  %v1955_v46 = vpop.f32.mrb[36].mxu0 }
 0x4bc   : > { %v1973_v47 = vrot.slane %v1972_v39, 1  ;;  %v2635_v48 = vadd.f32 %v1955_v46, %v1733_v61  ;;  %v1957_v49 = vpop.f32.mrb[37].mxu0 }
 0x4bd   : > { %v1982_v50 = vrot.slane %v1981_v43, 1  ;;  %v2636_v52 = vadd.f32 %v1957_v49, %v1737_v63 }
 0x4be   : > { %v1974_v9 = vmax.f32 %v1972_v39, %v1973_v47  ;;  %v1985_v54 = vmax.f32 %v1984_v0, %v2635_v48 }
 0x4bf   : > { %v1983_v32 = vmax.f32 %v1981_v43, %v1982_v50  ;;  %v1994_v55 = vmax.f32 %v1993_v12, %v2636_v52  ;;  %v1961_v58 = vpop.f32.mrb[38].mxu0 }
 0x4c0   : > { %v2637_v22 = vadd.f32 %v1961_v58, %v1733_v61  ;;  %v1963_v7 = vpop.f32.mrb[39].mxu0 }
 0x4c1   : > { %v2006_v13 = vcombine.low %v1974_v9, %v1983_v32  ;;  %v2638_v14 = vadd.f32 %v1963_v7, %v1737_v63 }
 0x4c2   : > { %v1986_v8 = vmax.f32 %v1985_v54, %v2637_v22 }
 0x4c3   : > { %v1995_v15 = vmax.f32 %v1994_v55, %v2638_v14  ;;  %v2013_v20 = vrot.slane %v2006_v13, %v2012_v17 }
 0x4c4   : > { %v1987_v16 = vrot.slane %v1986_v8, 4 }
 0x4c5   : > { %v1996_v62 = vrot.slane %v1995_v15, 4 }
 0x4c6   : > { %v1988_v36 = vmax.f32 %v1986_v8, %v1987_v16 }
 0x4c7   : > { %v1997_v35 = vmax.f32 %v1995_v15, %v1996_v62 }
 0x4c8   : > { %v1989_v10 = vrot.slane %v1988_v36, 2 }
 0x4c9   : > { %v1998_v42 = vrot.slane %v1997_v35, 2 }
 0x4ca   : > { %v1990_v3 = vmax.f32 %v1988_v36, %v1989_v10 }
 0x4cb   : > { %v1999_v5 = vmax.f32 %v1997_v35, %v1998_v42 }
 0x4cc   : > { %v1991_v26 = vrot.slane %v1990_v3, 1 }
 0x4cd   : > { %v2000_v61 = vrot.slane %v1999_v5, 1 }
 0x4ce   : > { %v1992_v6 = vmax.f32 %v1990_v3, %v1991_v26 }
 0x4cf   : > { %v2001_v63 = vmax.f32 %v1999_v5, %v2000_v61 }
 0x4d1   : > { %v2014_v18 = vcombine.low %v1992_v6, %v2001_v63 }
 0x4d3   : > { %v2021_v19 = vrot.slane %v2014_v18, %v2012_v17 }
 0x4d5   : > { %v2026_v21 = vrot.slane %v2021_v19, 7 }
 0x4d7   : > { %v2027_v56 = vsel %vm905_vm2, %v2026_v21, %v2013_v20 }
 0x4d8   : > { %v2029_v57 = vsel %vm2028_vm3, %v2026_v21, %v2027_v56 }
 0x4d9   : > { %v2031_v33 = vsel %vm2030_vm4, %v2026_v21, %v2029_v57 }
 0x4da   : > { %v2033_v24 = vsel %vm2032_vm5, %v2026_v21, %v2031_v33 }
 0x4db   : > { %2035 = vst [vmem:[%s414_s28] sm:$0xf] %v2033_v24 }
 0x4dc   : > { %2867 = shalt.err (!%p2864_p0)
}
 0x4dd   : > { %s2868_s15 = scalar_lea.hbm %s3422_s22, 64  ;;  %s2872_s18 = scalar_lea.hbm %s3474_s10, 128 }
 0x4de   : > { %p2869_p6 = scmp.ne.s32.totalorder %s3422_s22, %s2868_s15  ;;  %p2873_p13 = scmp.lt.u32.totalorder %s3422_s22, %s3474_s10 }
 0x4df   : > { %p2874_p12 = scmp.lt.u32.totalorder %s2872_s18, %s2868_s15  ;;  %p2876_p2 = scmp.lt.u32.totalorder %s2868_s15, %s3422_s22 }
 0x4e0   : > { %p2870_p9 = pnand %p2869_p6, %p3508_p3 }
 0x4e1   : > { %p2875_p1 = por %p2874_p12, %p2873_p13 }
 0x4e2   : > { %p2871_p10 = pneg %p2870_p9 }
 0x4e3   : > { %p2877_p4 = por %p2876_p2, %p2875_p1 }
 0x4e5   : > { %p2878_p7 = pnand %p2877_p4, %p2871_p10 }
 0x4e7   : > { %2881 = shalt.err (!%p2878_p7)
}
 0x4e8   : > { %2671 = dma.vmem_to_hbm [thread:$0]  (%p3508_p3), %s3424_s26, 64, %s3422_s22, %s2037_s17  }
 0x4e9 PF: > { %s3509_s20 = sld [smem:[#allocation15_spill]]  ;;  %s3510_s25 = sld [smem:[#allocation19_spill]] }
 0x4ea   : > { %p2698_p8 = scmp.ge.s32.totalorder %s2928_s16, 2 }
 0x4ef   : > { %s2063_s28 = sand.u32 1, %s3509_s20   ;;  %p3511_p11 = scmp.ne.s32.totalorder %s3510_s25, 0 }
 0x4f0   : > { %s2064_s13 = scalar_lea.sflag [#allocation4], %s2063_s28 }
 0x4f1   : > { %p2687_p5 = pnand %p2698_p8, %p3511_p11 }
 0x4f3   : > { %2911 = dma.done.wait (!%p2687_p5), %s2064_s13, 64  }
 0x4f4   : > { %2913 = vsyncadd (!%p2687_p5), %s2064_s13, 4294967232  ;;  %s3512_s16 = sld [smem:[#allocation17_spill]]  ;;  %s3513_s29 = sld [smem:[#allocation16_spill]] }
 0x4f5   : > { %s3514_s15 = sld [smem:[#allocation18_spill]]  ;;  %s3515_s13 = smov %s2920_s14 }
 0x4fa   : > { %p23_p0 = scmp.ge.s32.totalorder %s3512_s16, 4   ;;  %s3516_s14 = smov %s3513_s29 }
 0x4fc   :  { %25 = sbr.rel (!%p23_p0) target bundleno = 8 (0x8), region = 112 }
 0x503   :  { %2069 = vsyncpa [#allocation3], 1 }
 0x504   :  { %2071 = vsyncpa [#allocation3 + $0x1], 1 }
 0x505   :  { %2072 = vsyncpa [#allocation6], 1 }
 0x506   :  { %2073 = vsyncpa [#allocation9], 1 }
 0x507   :  { %2074 = vsyncpa [#allocation4], 1 }
 0x508   :  { %2076 = vsyncpa [#allocation4 + $0x1], 1 }

</bundles_post_ra>
